<compile_context>
chip_gen: v7x
topology: tpu7x:2x2x1
jax: 0.10.0
libtpu: 0.0.40
codegen_flags: <defaults>
</compile_context>

<pallas_src>
import functools
import math

import jax
import jax.numpy as jnp
import numpy as np
from jax.experimental import pallas as pl
from jax.experimental.pallas import tpu as pltpu


# ----------------------------------------------------------------------------
# Fused kernel: embedding -> +PE -> QKV -> MHA -> add&LN -> FFN -> add&LN -> FC
# ----------------------------------------------------------------------------

def _encoder_kernel(ids_ref, bias_ref, emb_ref, pe_ref,
                    wqkv_ref, bqkv_ref, wo_ref, bo_ref,
                    g1_ref, be1_ref,
                    w1_ref, b1_ref, w2_ref, b2_ref,
                    g2_ref, be2_ref,
                    wfc_ref, bfc_ref,
                    o_ref, *, batch, seq, n_heads):
    f32, bf16 = jnp.float32, jnp.bfloat16
    t = batch * seq
    d = wo_ref.shape[0]
    dh = d // n_heads
    vocab = emb_ref.shape[0]

    # ---- fused embedding lookup (one-hot matmul) + positional encoding -------
    ids = ids_ref[...]                                             # (T, 1) int32
    iota = jax.lax.broadcasted_iota(jnp.int32, (t, vocab), 1)      # (T, V)
    onehot = jnp.where(iota == ids, 1.0, 0.0).astype(bf16)         # (T, V)
    x = (jnp.dot(onehot, emb_ref[...], preferred_element_type=f32)
         + pe_ref[...])                                            # (T, D) f32
    # dropout(p=0.1) is identity in eval mode.

    # ---- fused Q/K/V projection on the flattened (B*S, D) token slab ---------
    qkv = (jnp.dot(x.astype(bf16), wqkv_ref[...],
                   preferred_element_type=f32) + bqkv_ref[...])    # (T, 3D) f32

    bias = bias_ref[...]                                           # (B, 1, S) additive mask

    # ---- multi-head self-attention; heads accumulated through Wo -------------
    # (query scale 1/sqrt(dh) is already folded into wq's columns.)
    # TODO(synk): at realistic S use lax.fori_loop over heads + scratch
    # accumulator to bound vreg live ranges.
    attn = jnp.zeros((t, d), f32)
    for h in range(n_heads):                       # static unroll (n_heads=4)
        q = qkv[:, h * dh:(h + 1) * dh].reshape(batch, seq, dh)
        k = qkv[:, d + h * dh:d + (h + 1) * dh].reshape(batch, seq, dh)
        v = qkv[:, 2 * d + h * dh:2 * d + (h + 1) * dh].reshape(batch, seq, dh)

        sc = jnp.einsum('bqd,bkd->bqk', q.astype(bf16), k.astype(bf16),
                        preferred_element_type=f32) + bias         # (B, S, S)
        smax = jnp.max(sc, axis=-1, keepdims=True)
        e = jnp.exp(sc - smax)
        denom = jnp.sum(e, axis=-1, keepdims=True)
        probs = e * pl.reciprocal(denom, approx=True)              # EUP slot
        ctx = jnp.einsum('bqk,bkd->bqd', probs.astype(bf16), v.astype(bf16),
                         preferred_element_type=f32)               # (B, S, Dh)

        # accumulate through the per-head slice of Wo (no lane concat)
        attn = attn + jnp.dot(ctx.reshape(t, dh).astype(bf16),
                              wo_ref[h * dh:(h + 1) * dh, :],
                              preferred_element_type=f32)          # (T, D)
    attn = attn + bo_ref[...]

    # ---- residual + LayerNorm 1 ----------------------------------------------
    h1 = x + attn
    mu1 = jnp.mean(h1, axis=-1, keepdims=True)
    var1 = jnp.mean((h1 - mu1) * (h1 - mu1), axis=-1, keepdims=True)
    x1 = (h1 - mu1) * jax.lax.rsqrt(var1 + 1e-5) * g1_ref[...] + be1_ref[...]

    # ---- feed-forward + residual + LayerNorm 2 --------------------------------
    f = (jnp.dot(x1.astype(bf16), w1_ref[...], preferred_element_type=f32)
         + b1_ref[...])
    f = jnp.maximum(f, 0.0)
    f = (jnp.dot(f.astype(bf16), w2_ref[...], preferred_element_type=f32)
         + b2_ref[...])
    h2 = x1 + f
    mu2 = jnp.mean(h2, axis=-1, keepdims=True)
    var2 = jnp.mean((h2 - mu2) * (h2 - mu2), axis=-1, keepdims=True)
    x2 = (h2 - mu2) * jax.lax.rsqrt(var2 + 1e-5) * g2_ref[...] + be2_ref[...]

    # ---- final fully-connected projection -------------------------------------
    out = (jnp.dot(x2.astype(bf16), wfc_ref[...], preferred_element_type=f32)
           + bfc_ref[...])                                         # (T, D) f32
    o_ref[...] = out.reshape(batch, seq, d)


# ----------------------------------------------------------------------------
# Parameters & forward pass
# ----------------------------------------------------------------------------

def make_params(key, *, vocab, d_model, n_heads, d_ff, max_len):
    ks = jax.random.split(key, 12)
    std = 0.02
    bf16 = jnp.bfloat16
    dh = d_model // n_heads

    def w(k, shape):
        return (std * jax.random.normal(k, shape)).astype(jnp.float32)

    # sinusoidal positional encoding table
    pos = np.arange(max_len)[:, None].astype(np.float64)
    div = np.exp(np.arange(0, d_model, 2).astype(np.float64)
                 * -(math.log(10000.0) / d_model))
    pe = np.zeros((max_len, d_model), dtype=np.float64)
    pe[:, 0::2] = np.sin(pos * div)
    pe[:, 1::2] = np.cos(pos * div)

    # attention scale folded into wq (free vs. scaling the (S,S) scores)
    wq = w(ks[1], (d_model, d_model)) * (1.0 / math.sqrt(dh))
    wk = w(ks[2], (d_model, d_model))
    wv = w(ks[3], (d_model, d_model))

    return dict(
        emb=w(ks[0], (vocab, d_model)).astype(bf16),
        pe=jnp.asarray(pe, dtype=jnp.float32),
        # fused Q|K|V projection, bf16 MXU operands
        wqkv=jnp.concatenate([wq, wk, wv], axis=1).astype(bf16),    # (D, 3D)
        bqkv=w(ks[4], (1, 3 * d_model)),
        wo=w(ks[5], (d_model, d_model)).astype(bf16),
        bo=w(ks[6], (1, d_model)),
        w1=w(ks[7], (d_model, d_ff)).astype(bf16),
        b1=w(ks[8], (1, d_ff)),
        w2=w(ks[9], (d_ff, d_model)).astype(bf16),
        b2=w(ks[10], (1, d_model)),
        g1=jnp.ones((1, d_model), jnp.float32),
        be1=jnp.zeros((1, d_model), jnp.float32),
        g2=jnp.ones((1, d_model), jnp.float32),
        be2=jnp.zeros((1, d_model), jnp.float32),
        # TODO(synk): original `nn.Linear(model_dimensionality)` is missing
        # out_features; we use d_model -> d_model.
        wfc=w(ks[11], (d_model, d_model)).astype(bf16),
        bfc=jnp.zeros((1, d_model), jnp.float32),
        n_heads=n_heads,
    )


def encoder_ensemble_forward(params, source):
    """source: (B, S) int32 token ids. Returns (B, S, D) float32."""
    b, s = source.shape
    d = params["wo"].shape[0]
    t = b * s

    # flattened token ids for the in-kernel one-hot embedding gather
    ids2d = source.reshape(t, 1).astype(jnp.int32)
    # additive attention bias: 0 where token valid, -1e9 where padding
    # TODO(synk): original forward calls generate_mask(source) with one arg
    # (signature takes two); only the encoder/source mask is used here.
    bias = jnp.where(source != 0, 0.0, -1e9).astype(jnp.float32)[:, None, :]
    # PE tiled over the flattened token slab (B*S, D)
    pe_rep = jnp.tile(params["pe"][:s], (b, 1))

    kern = functools.partial(_encoder_kernel, batch=b, seq=s,
                             n_heads=params["n_heads"])

    # Single fused pallas_call, no grid: every operand is one full VMEM block,
    # weights are copied in exactly once (no double-buffering).
    return pl.pallas_call(
        kern,
        out_shape=jax.ShapeDtypeStruct((b, s, d), jnp.float32),
    )(ids2d, bias, params["emb"], pe_rep,
      params["wqkv"], params["bqkv"], params["wo"], params["bo"],
      params["g1"], params["be1"],
      params["w1"], params["b1"], params["w2"], params["b2"],
      params["g2"], params["be2"], params["wfc"], params["bfc"])


# ----------------------------------------------------------------------------
# main
# ----------------------------------------------------------------------------

if __name__ == "__main__":
    B, S = 2, 8
    VOCAB, D_MODEL, N_HEADS, D_FF = 16, 128, 4, 128   # lane-dense D (=128)

    key = jax.random.PRNGKey(0)
    k_tok, k_param = jax.random.split(key)

    # token ids in [0, VOCAB); force some zeros so the padding mask is exercised
    source = jax.random.randint(k_tok, (B, S), 0, VOCAB, dtype=jnp.int32)
    source = source.at[:, -2:].set(0)

    params = make_params(k_param, vocab=VOCAB, d_model=D_MODEL,
                         n_heads=N_HEADS, d_ff=D_FF, max_len=S)

    out = encoder_ensemble_forward(params, source)
    out = jax.block_until_ready(out)

    assert out.shape == (B, S, D_MODEL) and out.dtype == jnp.float32
    assert bool(jnp.all(jnp.isfinite(out)))
    print("KERNEL_OK")
</pallas_src>

<mosaic_0001>
module attributes {stable_mosaic.version = 11 : i64} {
  func.func @_encoder_kernel(%arg0: memref<16x1xi32, #tpu.memory_space<vmem>>, %arg1: memref<2x1x8xf32, #tpu.memory_space<vmem>>, %arg2: memref<16x128xbf16, #tpu.memory_space<vmem>>, %arg3: memref<16x128xf32, #tpu.memory_space<vmem>>, %arg4: memref<128x384xbf16, #tpu.memory_space<vmem>>, %arg5: memref<1x384xf32, #tpu.memory_space<vmem>>, %arg6: memref<128x128xbf16, #tpu.memory_space<vmem>>, %arg7: memref<1x128xf32, #tpu.memory_space<vmem>>, %arg8: memref<1x128xf32, #tpu.memory_space<vmem>>, %arg9: memref<1x128xf32, #tpu.memory_space<vmem>>, %arg10: memref<128x128xbf16, #tpu.memory_space<vmem>>, %arg11: memref<1x128xf32, #tpu.memory_space<vmem>>, %arg12: memref<128x128xbf16, #tpu.memory_space<vmem>>, %arg13: memref<1x128xf32, #tpu.memory_space<vmem>>, %arg14: memref<1x128xf32, #tpu.memory_space<vmem>>, %arg15: memref<1x128xf32, #tpu.memory_space<vmem>>, %arg16: memref<128x128xbf16, #tpu.memory_space<vmem>>, %arg17: memref<1x128xf32, #tpu.memory_space<vmem>>, %arg18: memref<2x8x128xf32, #tpu.memory_space<vmem>>) attributes {dimension_semantics = [], scalar_prefetch = 0 : i64, scratch_operands = 0 : i64, tpu.core_type = #tpu.core_type<tc>} {
    %c0 = arith.constant 0 : index
    %c0_0 = arith.constant 0 : index
    %0 = vector.load %arg0[%c0, %c0_0] : memref<16x1xi32, #tpu.memory_space<vmem>>, vector<16x1xi32>
    %1 = tpu.iota {dimensions = array<i32: 1>} : vector<16x16xi32>
    %2 = vector.broadcast %0 : vector<16x1xi32> to vector<16x16xi32>
    %3 = arith.cmpi eq, %1, %2 : vector<16x16xi32>
    %cst = arith.constant 1.000000e+00 : f32
    %cst_1 = arith.constant 0.000000e+00 : f32
    %4 = vector.broadcast %cst : f32 to vector<16x16xf32>
    %5 = vector.broadcast %cst_1 : f32 to vector<16x16xf32>
    %6 = arith.select %3, %4, %5 : vector<16x16xi1>, vector<16x16xf32>
    %7 = arith.truncf %6 : vector<16x16xf32> to vector<16x16xbf16>
    %c0_2 = arith.constant 0 : index
    %c0_3 = arith.constant 0 : index
    %8 = vector.load %arg2[%c0_2, %c0_3] : memref<16x128xbf16, #tpu.memory_space<vmem>>, vector<16x128xbf16>
    %cst_4 = arith.constant dense<0.000000e+00> : vector<16x128xf32>
    %9 = tpu.matmul %7, %8, %cst_4 {dimension_numbers = #tpu.dot_dimension_numbers<[1], [0], [0], [1], [0, 0, 1, 1], [], []>} : vector<16x16xbf16>, vector<16x128xbf16>, vector<16x128xf32> -> vector<16x128xf32>
    %c0_5 = arith.constant 0 : index
    %c0_6 = arith.constant 0 : index
    %10 = vector.load %arg3[%c0_5, %c0_6] : memref<16x128xf32, #tpu.memory_space<vmem>>, vector<16x128xf32>
    %11 = arith.addf %9, %10 : vector<16x128xf32>
    %12 = arith.truncf %11 : vector<16x128xf32> to vector<16x128xbf16>
    %c0_7 = arith.constant 0 : index
    %c0_8 = arith.constant 0 : index
    %13 = vector.load %arg4[%c0_7, %c0_8] : memref<128x384xbf16, #tpu.memory_space<vmem>>, vector<128x384xbf16>
    %cst_9 = arith.constant dense<0.000000e+00> : vector<16x384xf32>
    %14 = tpu.matmul %12, %13, %cst_9 {dimension_numbers = #tpu.dot_dimension_numbers<[1], [0], [0], [1], [0, 0, 1, 1], [], []>} : vector<16x128xbf16>, vector<128x384xbf16>, vector<16x384xf32> -> vector<16x384xf32>
    %c0_10 = arith.constant 0 : index
    %c0_11 = arith.constant 0 : index
    %15 = vector.load %arg5[%c0_10, %c0_11] : memref<1x384xf32, #tpu.memory_space<vmem>>, vector<1x384xf32>
    %16 = vector.broadcast %15 : vector<1x384xf32> to vector<16x384xf32>
    %17 = arith.addf %14, %16 : vector<16x384xf32>
    %c0_12 = arith.constant 0 : index
    %c0_13 = arith.constant 0 : index
    %c0_14 = arith.constant 0 : index
    %18 = vector.load %arg1[%c0_12, %c0_13, %c0_14] : memref<2x1x8xf32, #tpu.memory_space<vmem>>, vector<2x1x8xf32>
    %cst_15 = arith.constant 0.000000e+00 : f32
    %19 = vector.broadcast %cst_15 : f32 to vector<16x128xf32>
    %20 = vector.extract_strided_slice %17 {offsets = [0, 0], sizes = [16, 32], strides = [1, 1]} : vector<16x384xf32> to vector<16x32xf32>
    %21 = vector.shape_cast %20 : vector<16x32xf32> to vector<2x8x32xf32>
    %22 = vector.extract_strided_slice %17 {offsets = [0, 128], sizes = [16, 32], strides = [1, 1]} : vector<16x384xf32> to vector<16x32xf32>
    %23 = vector.shape_cast %22 : vector<16x32xf32> to vector<2x8x32xf32>
    %24 = vector.extract_strided_slice %17 {offsets = [0, 256], sizes = [16, 32], strides = [1, 1]} : vector<16x384xf32> to vector<16x32xf32>
    %25 = vector.shape_cast %24 : vector<16x32xf32> to vector<2x8x32xf32>
    %26 = arith.truncf %21 : vector<2x8x32xf32> to vector<2x8x32xbf16>
    %27 = arith.truncf %23 : vector<2x8x32xf32> to vector<2x8x32xbf16>
    "tpu.trace_start"() <{level = 10 : i32, message = "bqd,bkd->bqk"}> : () -> ()
    %cst_16 = arith.constant dense<0.000000e+00> : vector<2x8x8xf32>
    %28 = tpu.matmul %26, %27, %cst_16 {dimension_numbers = #tpu.dot_dimension_numbers<[2], [2], [1], [1], [0, 0, 0, 1, 1, 1], [0], [0]>} : vector<2x8x32xbf16>, vector<2x8x32xbf16>, vector<2x8x8xf32> -> vector<2x8x8xf32>
    "tpu.trace_stop"() : () -> ()
    %29 = vector.broadcast %18 : vector<2x1x8xf32> to vector<2x8x8xf32>
    %30 = arith.addf %28, %29 : vector<2x8x8xf32>
    %cst_17 = arith.constant dense<0xFF800000> : vector<2x8xf32>
    %31 = vector.multi_reduction <maximumf>, %30, %cst_17 [2] : vector<2x8x8xf32> to vector<2x8xf32>
    %32 = vector.shape_cast %31 : vector<2x8xf32> to vector<2x8x1xf32>
    %33 = vector.broadcast %32 : vector<2x8x1xf32> to vector<2x8x8xf32>
    %34 = arith.subf %30, %33 : vector<2x8x8xf32>
    %35 = math.exp %34 : vector<2x8x8xf32>
    %cst_18 = arith.constant dense<0.000000e+00> : vector<2x8xf32>
    %36 = vector.multi_reduction <add>, %35, %cst_18 [2] : vector<2x8x8xf32> to vector<2x8xf32>
    %37 = vector.shape_cast %36 : vector<2x8xf32> to vector<2x8x1xf32>
    %38 = tpu.reciprocal %37 {approx = true} : vector<2x8x1xf32> -> vector<2x8x1xf32>
    %39 = vector.broadcast %38 : vector<2x8x1xf32> to vector<2x8x8xf32>
    %40 = arith.mulf %35, %39 : vector<2x8x8xf32>
    %41 = arith.truncf %40 : vector<2x8x8xf32> to vector<2x8x8xbf16>
    %42 = arith.truncf %25 : vector<2x8x32xf32> to vector<2x8x32xbf16>
    "tpu.trace_start"() <{level = 10 : i32, message = "bqk,bkd->bqd"}> : () -> ()
    %cst_19 = arith.constant dense<0.000000e+00> : vector<2x8x32xf32>
    %43 = tpu.matmul %41, %42, %cst_19 {dimension_numbers = #tpu.dot_dimension_numbers<[2], [1], [1], [2], [0, 0, 0, 1, 1, 2], [0], [0]>} : vector<2x8x8xbf16>, vector<2x8x32xbf16>, vector<2x8x32xf32> -> vector<2x8x32xf32>
    "tpu.trace_stop"() : () -> ()
    %44 = vector.shape_cast %43 : vector<2x8x32xf32> to vector<16x32xf32>
    %45 = arith.truncf %44 : vector<16x32xf32> to vector<16x32xbf16>
    %c0_20 = arith.constant 0 : index
    %c0_21 = arith.constant 0 : index
    %46 = vector.load %arg6[%c0_20, %c0_21] : memref<128x128xbf16, #tpu.memory_space<vmem>>, vector<32x128xbf16>
    %cst_22 = arith.constant dense<0.000000e+00> : vector<16x128xf32>
    %47 = tpu.matmul %45, %46, %cst_22 {dimension_numbers = #tpu.dot_dimension_numbers<[1], [0], [0], [1], [0, 0, 1, 1], [], []>} : vector<16x32xbf16>, vector<32x128xbf16>, vector<16x128xf32> -> vector<16x128xf32>
    %48 = arith.addf %19, %47 : vector<16x128xf32>
    %49 = vector.extract_strided_slice %17 {offsets = [0, 32], sizes = [16, 32], strides = [1, 1]} : vector<16x384xf32> to vector<16x32xf32>
    %50 = vector.shape_cast %49 : vector<16x32xf32> to vector<2x8x32xf32>
    %51 = vector.extract_strided_slice %17 {offsets = [0, 160], sizes = [16, 32], strides = [1, 1]} : vector<16x384xf32> to vector<16x32xf32>
    %52 = vector.shape_cast %51 : vector<16x32xf32> to vector<2x8x32xf32>
    %53 = vector.extract_strided_slice %17 {offsets = [0, 288], sizes = [16, 32], strides = [1, 1]} : vector<16x384xf32> to vector<16x32xf32>
    %54 = vector.shape_cast %53 : vector<16x32xf32> to vector<2x8x32xf32>
    %55 = arith.truncf %50 : vector<2x8x32xf32> to vector<2x8x32xbf16>
    %56 = arith.truncf %52 : vector<2x8x32xf32> to vector<2x8x32xbf16>
    "tpu.trace_start"() <{level = 10 : i32, message = "bqd,bkd->bqk"}> : () -> ()
    %cst_23 = arith.constant dense<0.000000e+00> : vector<2x8x8xf32>
    %57 = tpu.matmul %55, %56, %cst_23 {dimension_numbers = #tpu.dot_dimension_numbers<[2], [2], [1], [1], [0, 0, 0, 1, 1, 1], [0], [0]>} : vector<2x8x32xbf16>, vector<2x8x32xbf16>, vector<2x8x8xf32> -> vector<2x8x8xf32>
    "tpu.trace_stop"() : () -> ()
    %58 = vector.broadcast %18 : vector<2x1x8xf32> to vector<2x8x8xf32>
    %59 = arith.addf %57, %58 : vector<2x8x8xf32>
    %cst_24 = arith.constant dense<0xFF800000> : vector<2x8xf32>
    %60 = vector.multi_reduction <maximumf>, %59, %cst_24 [2] : vector<2x8x8xf32> to vector<2x8xf32>
    %61 = vector.shape_cast %60 : vector<2x8xf32> to vector<2x8x1xf32>
    %62 = vector.broadcast %61 : vector<2x8x1xf32> to vector<2x8x8xf32>
    %63 = arith.subf %59, %62 : vector<2x8x8xf32>
    %64 = math.exp %63 : vector<2x8x8xf32>
    %cst_25 = arith.constant dense<0.000000e+00> : vector<2x8xf32>
    %65 = vector.multi_reduction <add>, %64, %cst_25 [2] : vector<2x8x8xf32> to vector<2x8xf32>
    %66 = vector.shape_cast %65 : vector<2x8xf32> to vector<2x8x1xf32>
    %67 = tpu.reciprocal %66 {approx = true} : vector<2x8x1xf32> -> vector<2x8x1xf32>
    %68 = vector.broadcast %67 : vector<2x8x1xf32> to vector<2x8x8xf32>
    %69 = arith.mulf %64, %68 : vector<2x8x8xf32>
    %70 = arith.truncf %69 : vector<2x8x8xf32> to vector<2x8x8xbf16>
    %71 = arith.truncf %54 : vector<2x8x32xf32> to vector<2x8x32xbf16>
    "tpu.trace_start"() <{level = 10 : i32, message = "bqk,bkd->bqd"}> : () -> ()
    %cst_26 = arith.constant dense<0.000000e+00> : vector<2x8x32xf32>
    %72 = tpu.matmul %70, %71, %cst_26 {dimension_numbers = #tpu.dot_dimension_numbers<[2], [1], [1], [2], [0, 0, 0, 1, 1, 2], [0], [0]>} : vector<2x8x8xbf16>, vector<2x8x32xbf16>, vector<2x8x32xf32> -> vector<2x8x32xf32>
    "tpu.trace_stop"() : () -> ()
    %73 = vector.shape_cast %72 : vector<2x8x32xf32> to vector<16x32xf32>
    %74 = arith.truncf %73 : vector<16x32xf32> to vector<16x32xbf16>
    %c32 = arith.constant 32 : index
    %c0_27 = arith.constant 0 : index
    %75 = vector.load %arg6[%c32, %c0_27] : memref<128x128xbf16, #tpu.memory_space<vmem>>, vector<32x128xbf16>
    %cst_28 = arith.constant dense<0.000000e+00> : vector<16x128xf32>
    %76 = tpu.matmul %74, %75, %cst_28 {dimension_numbers = #tpu.dot_dimension_numbers<[1], [0], [0], [1], [0, 0, 1, 1], [], []>} : vector<16x32xbf16>, vector<32x128xbf16>, vector<16x128xf32> -> vector<16x128xf32>
    %77 = arith.addf %48, %76 : vector<16x128xf32>
    %78 = vector.extract_strided_slice %17 {offsets = [0, 64], sizes = [16, 32], strides = [1, 1]} : vector<16x384xf32> to vector<16x32xf32>
    %79 = vector.shape_cast %78 : vector<16x32xf32> to vector<2x8x32xf32>
    %80 = vector.extract_strided_slice %17 {offsets = [0, 192], sizes = [16, 32], strides = [1, 1]} : vector<16x384xf32> to vector<16x32xf32>
    %81 = vector.shape_cast %80 : vector<16x32xf32> to vector<2x8x32xf32>
    %82 = vector.extract_strided_slice %17 {offsets = [0, 320], sizes = [16, 32], strides = [1, 1]} : vector<16x384xf32> to vector<16x32xf32>
    %83 = vector.shape_cast %82 : vector<16x32xf32> to vector<2x8x32xf32>
    %84 = arith.truncf %79 : vector<2x8x32xf32> to vector<2x8x32xbf16>
    %85 = arith.truncf %81 : vector<2x8x32xf32> to vector<2x8x32xbf16>
    "tpu.trace_start"() <{level = 10 : i32, message = "bqd,bkd->bqk"}> : () -> ()
    %cst_29 = arith.constant dense<0.000000e+00> : vector<2x8x8xf32>
    %86 = tpu.matmul %84, %85, %cst_29 {dimension_numbers = #tpu.dot_dimension_numbers<[2], [2], [1], [1], [0, 0, 0, 1, 1, 1], [0], [0]>} : vector<2x8x32xbf16>, vector<2x8x32xbf16>, vector<2x8x8xf32> -> vector<2x8x8xf32>
    "tpu.trace_stop"() : () -> ()
    %87 = vector.broadcast %18 : vector<2x1x8xf32> to vector<2x8x8xf32>
    %88 = arith.addf %86, %87 : vector<2x8x8xf32>
    %cst_30 = arith.constant dense<0xFF800000> : vector<2x8xf32>
    %89 = vector.multi_reduction <maximumf>, %88, %cst_30 [2] : vector<2x8x8xf32> to vector<2x8xf32>
    %90 = vector.shape_cast %89 : vector<2x8xf32> to vector<2x8x1xf32>
    %91 = vector.broadcast %90 : vector<2x8x1xf32> to vector<2x8x8xf32>
    %92 = arith.subf %88, %91 : vector<2x8x8xf32>
    %93 = math.exp %92 : vector<2x8x8xf32>
    %cst_31 = arith.constant dense<0.000000e+00> : vector<2x8xf32>
    %94 = vector.multi_reduction <add>, %93, %cst_31 [2] : vector<2x8x8xf32> to vector<2x8xf32>
    %95 = vector.shape_cast %94 : vector<2x8xf32> to vector<2x8x1xf32>
    %96 = tpu.reciprocal %95 {approx = true} : vector<2x8x1xf32> -> vector<2x8x1xf32>
    %97 = vector.broadcast %96 : vector<2x8x1xf32> to vector<2x8x8xf32>
    %98 = arith.mulf %93, %97 : vector<2x8x8xf32>
    %99 = arith.truncf %98 : vector<2x8x8xf32> to vector<2x8x8xbf16>
    %100 = arith.truncf %83 : vector<2x8x32xf32> to vector<2x8x32xbf16>
    "tpu.trace_start"() <{level = 10 : i32, message = "bqk,bkd->bqd"}> : () -> ()
    %cst_32 = arith.constant dense<0.000000e+00> : vector<2x8x32xf32>
    %101 = tpu.matmul %99, %100, %cst_32 {dimension_numbers = #tpu.dot_dimension_numbers<[2], [1], [1], [2], [0, 0, 0, 1, 1, 2], [0], [0]>} : vector<2x8x8xbf16>, vector<2x8x32xbf16>, vector<2x8x32xf32> -> vector<2x8x32xf32>
    "tpu.trace_stop"() : () -> ()
    %102 = vector.shape_cast %101 : vector<2x8x32xf32> to vector<16x32xf32>
    %103 = arith.truncf %102 : vector<16x32xf32> to vector<16x32xbf16>
    %c64 = arith.constant 64 : index
    %c0_33 = arith.constant 0 : index
    %104 = vector.load %arg6[%c64, %c0_33] : memref<128x128xbf16, #tpu.memory_space<vmem>>, vector<32x128xbf16>
    %cst_34 = arith.constant dense<0.000000e+00> : vector<16x128xf32>
    %105 = tpu.matmul %103, %104, %cst_34 {dimension_numbers = #tpu.dot_dimension_numbers<[1], [0], [0], [1], [0, 0, 1, 1], [], []>} : vector<16x32xbf16>, vector<32x128xbf16>, vector<16x128xf32> -> vector<16x128xf32>
    %106 = arith.addf %77, %105 : vector<16x128xf32>
    %107 = vector.extract_strided_slice %17 {offsets = [0, 96], sizes = [16, 32], strides = [1, 1]} : vector<16x384xf32> to vector<16x32xf32>
    %108 = vector.shape_cast %107 : vector<16x32xf32> to vector<2x8x32xf32>
    %109 = vector.extract_strided_slice %17 {offsets = [0, 224], sizes = [16, 32], strides = [1, 1]} : vector<16x384xf32> to vector<16x32xf32>
    %110 = vector.shape_cast %109 : vector<16x32xf32> to vector<2x8x32xf32>
    %111 = vector.extract_strided_slice %17 {offsets = [0, 352], sizes = [16, 32], strides = [1, 1]} : vector<16x384xf32> to vector<16x32xf32>
    %112 = vector.shape_cast %111 : vector<16x32xf32> to vector<2x8x32xf32>
    %113 = arith.truncf %108 : vector<2x8x32xf32> to vector<2x8x32xbf16>
    %114 = arith.truncf %110 : vector<2x8x32xf32> to vector<2x8x32xbf16>
    "tpu.trace_start"() <{level = 10 : i32, message = "bqd,bkd->bqk"}> : () -> ()
    %cst_35 = arith.constant dense<0.000000e+00> : vector<2x8x8xf32>
    %115 = tpu.matmul %113, %114, %cst_35 {dimension_numbers = #tpu.dot_dimension_numbers<[2], [2], [1], [1], [0, 0, 0, 1, 1, 1], [0], [0]>} : vector<2x8x32xbf16>, vector<2x8x32xbf16>, vector<2x8x8xf32> -> vector<2x8x8xf32>
    "tpu.trace_stop"() : () -> ()
    %116 = vector.broadcast %18 : vector<2x1x8xf32> to vector<2x8x8xf32>
    %117 = arith.addf %115, %116 : vector<2x8x8xf32>
    %cst_36 = arith.constant dense<0xFF800000> : vector<2x8xf32>
    %118 = vector.multi_reduction <maximumf>, %117, %cst_36 [2] : vector<2x8x8xf32> to vector<2x8xf32>
    %119 = vector.shape_cast %118 : vector<2x8xf32> to vector<2x8x1xf32>
    %120 = vector.broadcast %119 : vector<2x8x1xf32> to vector<2x8x8xf32>
    %121 = arith.subf %117, %120 : vector<2x8x8xf32>
    %122 = math.exp %121 : vector<2x8x8xf32>
    %cst_37 = arith.constant dense<0.000000e+00> : vector<2x8xf32>
    %123 = vector.multi_reduction <add>, %122, %cst_37 [2] : vector<2x8x8xf32> to vector<2x8xf32>
    %124 = vector.shape_cast %123 : vector<2x8xf32> to vector<2x8x1xf32>
    %125 = tpu.reciprocal %124 {approx = true} : vector<2x8x1xf32> -> vector<2x8x1xf32>
    %126 = vector.broadcast %125 : vector<2x8x1xf32> to vector<2x8x8xf32>
    %127 = arith.mulf %122, %126 : vector<2x8x8xf32>
    %128 = arith.truncf %127 : vector<2x8x8xf32> to vector<2x8x8xbf16>
    %129 = arith.truncf %112 : vector<2x8x32xf32> to vector<2x8x32xbf16>
    "tpu.trace_start"() <{level = 10 : i32, message = "bqk,bkd->bqd"}> : () -> ()
    %cst_38 = arith.constant dense<0.000000e+00> : vector<2x8x32xf32>
    %130 = tpu.matmul %128, %129, %cst_38 {dimension_numbers = #tpu.dot_dimension_numbers<[2], [1], [1], [2], [0, 0, 0, 1, 1, 2], [0], [0]>} : vector<2x8x8xbf16>, vector<2x8x32xbf16>, vector<2x8x32xf32> -> vector<2x8x32xf32>
    "tpu.trace_stop"() : () -> ()
    %131 = vector.shape_cast %130 : vector<2x8x32xf32> to vector<16x32xf32>
    %132 = arith.truncf %131 : vector<16x32xf32> to vector<16x32xbf16>
    %c96 = arith.constant 96 : index
    %c0_39 = arith.constant 0 : index
    %133 = vector.load %arg6[%c96, %c0_39] : memref<128x128xbf16, #tpu.memory_space<vmem>>, vector<32x128xbf16>
    %cst_40 = arith.constant dense<0.000000e+00> : vector<16x128xf32>
    %134 = tpu.matmul %132, %133, %cst_40 {dimension_numbers = #tpu.dot_dimension_numbers<[1], [0], [0], [1], [0, 0, 1, 1], [], []>} : vector<16x32xbf16>, vector<32x128xbf16>, vector<16x128xf32> -> vector<16x128xf32>
    %135 = arith.addf %106, %134 : vector<16x128xf32>
    %c0_41 = arith.constant 0 : index
    %c0_42 = arith.constant 0 : index
    %136 = vector.load %arg7[%c0_41, %c0_42] : memref<1x128xf32, #tpu.memory_space<vmem>>, vector<1x128xf32>
    %137 = vector.broadcast %136 : vector<1x128xf32> to vector<16x128xf32>
    %138 = arith.addf %135, %137 : vector<16x128xf32>
    %139 = arith.addf %11, %138 : vector<16x128xf32>
    %cst_43 = arith.constant dense<0.000000e+00> : vector<16xf32>
    %140 = vector.multi_reduction <add>, %139, %cst_43 [1] : vector<16x128xf32> to vector<16xf32>
    %141 = vector.shape_cast %140 : vector<16xf32> to vector<16x1xf32>
    %cst_44 = arith.constant 1.280000e+02 : f32
    %142 = vector.broadcast %cst_44 : f32 to vector<16x1xf32>
    %143 = arith.divf %141, %142 : vector<16x1xf32>
    %144 = vector.broadcast %143 : vector<16x1xf32> to vector<16x128xf32>
    %145 = arith.subf %139, %144 : vector<16x128xf32>
    %146 = vector.broadcast %143 : vector<16x1xf32> to vector<16x128xf32>
    %147 = arith.subf %139, %146 : vector<16x128xf32>
    %148 = arith.mulf %145, %147 : vector<16x128xf32>
    %cst_45 = arith.constant dense<0.000000e+00> : vector<16xf32>
    %149 = vector.multi_reduction <add>, %148, %cst_45 [1] : vector<16x128xf32> to vector<16xf32>
    %150 = vector.shape_cast %149 : vector<16xf32> to vector<16x1xf32>
    %cst_46 = arith.constant 1.280000e+02 : f32
    %151 = vector.broadcast %cst_46 : f32 to vector<16x1xf32>
    %152 = arith.divf %150, %151 : vector<16x1xf32>
    %153 = vector.broadcast %143 : vector<16x1xf32> to vector<16x128xf32>
    %154 = arith.subf %139, %153 : vector<16x128xf32>
    %cst_47 = arith.constant 9.99999974E-6 : f32
    %155 = vector.broadcast %cst_47 : f32 to vector<16x1xf32>
    %156 = arith.addf %152, %155 : vector<16x1xf32>
    %157 = math.rsqrt %156 : vector<16x1xf32>
    %158 = vector.broadcast %157 : vector<16x1xf32> to vector<16x128xf32>
    %159 = arith.mulf %154, %158 : vector<16x128xf32>
    %c0_48 = arith.constant 0 : index
    %c0_49 = arith.constant 0 : index
    %160 = vector.load %arg8[%c0_48, %c0_49] : memref<1x128xf32, #tpu.memory_space<vmem>>, vector<1x128xf32>
    %161 = vector.broadcast %160 : vector<1x128xf32> to vector<16x128xf32>
    %162 = arith.mulf %159, %161 : vector<16x128xf32>
    %c0_50 = arith.constant 0 : index
    %c0_51 = arith.constant 0 : index
    %163 = vector.load %arg9[%c0_50, %c0_51] : memref<1x128xf32, #tpu.memory_space<vmem>>, vector<1x128xf32>
    %164 = vector.broadcast %163 : vector<1x128xf32> to vector<16x128xf32>
    %165 = arith.addf %162, %164 : vector<16x128xf32>
    %166 = arith.truncf %165 : vector<16x128xf32> to vector<16x128xbf16>
    %c0_52 = arith.constant 0 : index
    %c0_53 = arith.constant 0 : index
    %167 = vector.load %arg10[%c0_52, %c0_53] : memref<128x128xbf16, #tpu.memory_space<vmem>>, vector<128x128xbf16>
    %cst_54 = arith.constant dense<0.000000e+00> : vector<16x128xf32>
    %168 = tpu.matmul %166, %167, %cst_54 {dimension_numbers = #tpu.dot_dimension_numbers<[1], [0], [0], [1], [0, 0, 1, 1], [], []>} : vector<16x128xbf16>, vector<128x128xbf16>, vector<16x128xf32> -> vector<16x128xf32>
    %c0_55 = arith.constant 0 : index
    %c0_56 = arith.constant 0 : index
    %169 = vector.load %arg11[%c0_55, %c0_56] : memref<1x128xf32, #tpu.memory_space<vmem>>, vector<1x128xf32>
    %170 = vector.broadcast %169 : vector<1x128xf32> to vector<16x128xf32>
    %171 = arith.addf %168, %170 : vector<16x128xf32>
    %cst_57 = arith.constant 0.000000e+00 : f32
    %172 = vector.broadcast %cst_57 : f32 to vector<16x128xf32>
    %173 = arith.maximumf %171, %172 : vector<16x128xf32>
    %174 = arith.truncf %173 : vector<16x128xf32> to vector<16x128xbf16>
    %c0_58 = arith.constant 0 : index
    %c0_59 = arith.constant 0 : index
    %175 = vector.load %arg12[%c0_58, %c0_59] : memref<128x128xbf16, #tpu.memory_space<vmem>>, vector<128x128xbf16>
    %cst_60 = arith.constant dense<0.000000e+00> : vector<16x128xf32>
    %176 = tpu.matmul %174, %175, %cst_60 {dimension_numbers = #tpu.dot_dimension_numbers<[1], [0], [0], [1], [0, 0, 1, 1], [], []>} : vector<16x128xbf16>, vector<128x128xbf16>, vector<16x128xf32> -> vector<16x128xf32>
    %c0_61 = arith.constant 0 : index
    %c0_62 = arith.constant 0 : index
    %177 = vector.load %arg13[%c0_61, %c0_62] : memref<1x128xf32, #tpu.memory_space<vmem>>, vector<1x128xf32>
    %178 = vector.broadcast %177 : vector<1x128xf32> to vector<16x128xf32>
    %179 = arith.addf %176, %178 : vector<16x128xf32>
    %180 = arith.addf %165, %179 : vector<16x128xf32>
    %cst_63 = arith.constant dense<0.000000e+00> : vector<16xf32>
    %181 = vector.multi_reduction <add>, %180, %cst_63 [1] : vector<16x128xf32> to vector<16xf32>
    %182 = vector.shape_cast %181 : vector<16xf32> to vector<16x1xf32>
    %cst_64 = arith.constant 1.280000e+02 : f32
    %183 = vector.broadcast %cst_64 : f32 to vector<16x1xf32>
    %184 = arith.divf %182, %183 : vector<16x1xf32>
    %185 = vector.broadcast %184 : vector<16x1xf32> to vector<16x128xf32>
    %186 = arith.subf %180, %185 : vector<16x128xf32>
    %187 = vector.broadcast %184 : vector<16x1xf32> to vector<16x128xf32>
    %188 = arith.subf %180, %187 : vector<16x128xf32>
    %189 = arith.mulf %186, %188 : vector<16x128xf32>
    %cst_65 = arith.constant dense<0.000000e+00> : vector<16xf32>
    %190 = vector.multi_reduction <add>, %189, %cst_65 [1] : vector<16x128xf32> to vector<16xf32>
    %191 = vector.shape_cast %190 : vector<16xf32> to vector<16x1xf32>
    %cst_66 = arith.constant 1.280000e+02 : f32
    %192 = vector.broadcast %cst_66 : f32 to vector<16x1xf32>
    %193 = arith.divf %191, %192 : vector<16x1xf32>
    %194 = vector.broadcast %184 : vector<16x1xf32> to vector<16x128xf32>
    %195 = arith.subf %180, %194 : vector<16x128xf32>
    %cst_67 = arith.constant 9.99999974E-6 : f32
    %196 = vector.broadcast %cst_67 : f32 to vector<16x1xf32>
    %197 = arith.addf %193, %196 : vector<16x1xf32>
    %198 = math.rsqrt %197 : vector<16x1xf32>
    %199 = vector.broadcast %198 : vector<16x1xf32> to vector<16x128xf32>
    %200 = arith.mulf %195, %199 : vector<16x128xf32>
    %c0_68 = arith.constant 0 : index
    %c0_69 = arith.constant 0 : index
    %201 = vector.load %arg14[%c0_68, %c0_69] : memref<1x128xf32, #tpu.memory_space<vmem>>, vector<1x128xf32>
    %202 = vector.broadcast %201 : vector<1x128xf32> to vector<16x128xf32>
    %203 = arith.mulf %200, %202 : vector<16x128xf32>
    %c0_70 = arith.constant 0 : index
    %c0_71 = arith.constant 0 : index
    %204 = vector.load %arg15[%c0_70, %c0_71] : memref<1x128xf32, #tpu.memory_space<vmem>>, vector<1x128xf32>
    %205 = vector.broadcast %204 : vector<1x128xf32> to vector<16x128xf32>
    %206 = arith.addf %203, %205 : vector<16x128xf32>
    %207 = arith.truncf %206 : vector<16x128xf32> to vector<16x128xbf16>
    %c0_72 = arith.constant 0 : index
    %c0_73 = arith.constant 0 : index
    %208 = vector.load %arg16[%c0_72, %c0_73] : memref<128x128xbf16, #tpu.memory_space<vmem>>, vector<128x128xbf16>
    %cst_74 = arith.constant dense<0.000000e+00> : vector<16x128xf32>
    %209 = tpu.matmul %207, %208, %cst_74 {dimension_numbers = #tpu.dot_dimension_numbers<[1], [0], [0], [1], [0, 0, 1, 1], [], []>} : vector<16x128xbf16>, vector<128x128xbf16>, vector<16x128xf32> -> vector<16x128xf32>
    %c0_75 = arith.constant 0 : index
    %c0_76 = arith.constant 0 : index
    %210 = vector.load %arg17[%c0_75, %c0_76] : memref<1x128xf32, #tpu.memory_space<vmem>>, vector<1x128xf32>
    %211 = vector.broadcast %210 : vector<1x128xf32> to vector<16x128xf32>
    %212 = arith.addf %209, %211 : vector<16x128xf32>
    %213 = vector.shape_cast %212 : vector<16x128xf32> to vector<2x8x128xf32>
    %c0_77 = arith.constant 0 : index
    %c0_78 = arith.constant 0 : index
    %c0_79 = arith.constant 0 : index
    %214 = vector.load %arg18[%c0_77, %c0_78, %c0_79] : memref<2x8x128xf32, #tpu.memory_space<vmem>>, vector<2x8x128xf32>
    tpu.vector_store %arg18[%c0_77, %c0_78, %c0_79], %213 {strides = array<i32>} : memref<2x8x128xf32, #tpu.memory_space<vmem>>, vector<2x8x128xf32>,
    return
  }
}

</mosaic_0001>

<bundles_post_ra>
// kernel: tpu_custom_call.1
= control target key start
LH: loop header
LB: loop body
LE: loop exit
PB: predicated region body
PF: predicated region fallthrough
CT: control target
= control target key end

     0   :  { %s3552_s0 = inlined_call_operand.vmem [shape: s32[16,1], index: 0, kind: input, shape index: {}]   ;;  %s3553_s1 = inlined_call_operand.vmem [shape: f32[2,1,8], index: 1, kind: input, shape index: {}]   ;;  %s3554_s2 = inlined_call_operand.vmem [shape: bf16[16,128], index: 2, kind: input, shape index: {}]   ;;  %s3555_s3 = inlined_call_operand.hbm [shape: f32[16,128], index: 3, kind: input, shape index: {}]   ;;  %s3556_s4 = inlined_call_operand.hbm [shape: bf16[128,384], index: 4, kind: input, shape index: {}]   ;;  %s3557_s5 = inlined_call_operand.vmem [shape: f32[1,384], index: 5, kind: input, shape index: {}]   ;;  %s3558_s6 = inlined_call_operand.hbm [shape: bf16[128,128], index: 6, kind: input, shape index: {}]   ;;  %s3559_s7 = inlined_call_operand.hbm [shape: f32[1,128], index: 7, kind: input, shape index: {}]   ;;  %s3560_s8 = inlined_call_operand.hbm [shape: f32[1,128], index: 8, kind: input, shape index: {}]   ;;  %s3561_s9 = inlined_call_operand.hbm [shape: f32[1,128], index: 9, kind: input, shape index: {}]   ;;  %s3562_s10 = inlined_call_operand.hbm [shape: bf16[128,128], index: 10, kind: input, shape index: {}]   ;;  %s3563_s11 = inlined_call_operand.hbm [shape: f32[1,128], index: 11, kind: input, shape index: {}]   ;;  %s3564_s12 = inlined_call_operand.hbm [shape: bf16[128,128], index: 12, kind: input, shape index: {}]   ;;  %s3565_s13 = inlined_call_operand.hbm [shape: f32[1,128], index: 13, kind: input, shape index: {}]   ;;  %s3566_s14 = inlined_call_operand.hbm [shape: f32[1,128], index: 14, kind: input, shape index: {}]   ;;  %s3567_s15 = inlined_call_operand.hbm [shape: f32[1,128], index: 15, kind: input, shape index: {}]   ;;  %s3568_s16 = inlined_call_operand.vmem [shape: bf16[128,128], index: 16, kind: input, shape index: {}]   ;;  %s3569_s17 = inlined_call_operand.vmem [shape: f32[1,128], index: 17, kind: input, shape index: {}]   ;;  %s3570_s18 = inlined_call_operand.hbm [shape: f32[2,8,128], index: 18, kind: output, shape index: {}]  }
   0x1   :  { %3574 = sst [smem:[#allocation31_spill]] %s3552_s0 }
   0x2   :  { %3575 = sst [smem:[#allocation32_spill]] %s3553_s1 }
   0x3   :  { %3576 = sst [smem:[#allocation33_spill]] %s3554_s2 }
   0x4   :  { %3577 = sst [smem:[#allocation34_spill]] %s3570_s18 }
   0x5   :  { %23 = vsyncpa [#allocation3], 0 }
   0x6   :  { %24 = vsyncpa [#allocation6], 0 }
   0x7   :  { %25 = vsyncpa [#allocation9], 0 }
   0x8   :  { %26 = vsyncpa [#allocation12], 0 }
   0x9   :  { %27 = vsyncpa [#allocation15], 0 }
   0xa   :  { %28 = vsyncpa [#allocation18], 0 }
   0xb   :  { %29 = vsyncpa [#allocation21], 0 }
   0xc   :  { %30 = vsyncpa [#allocation4], 0  ;;  %s2963_s27 = smov [#allocation5]   ;;  %s2661_s0 = scalar_lea.hbm %s3556_s4, 3072 }
   0xd   :  { %s54_s28 = sshll.u32 %s2963_s27, 4  ;;  %p2662_p0 = scmp.ne.s32.totalorder %s3556_s4, %s2661_s0  ;;  %s55_s28 = int_to_ptr.vmem [resolvable:$true] %s54_s28 }
   0xe   :  { %p2665_p1 = scmp.lt.u32.totalorder %s2661_s0, %s3556_s4 }
  0x10   :  { %p2667_p2 = pnand %p2665_p1, %p2662_p0 }
  0x12   :  { %2670 = shalt.err (!%p2667_p2)
}
  0x13   :  { %s2671_s22 = scalar_lea.vmem %s55_s28, 3072  ;;  %p2676_p4 = scmp.lt.s32.totalorder %s55_s28, %s55_s28 }
  0x14   :  { %p2672_p3 = scmp.ne.s32.totalorder %s55_s28, %s2671_s22  ;;  %p2677_p5 = scmp.lt.s32.totalorder %s2671_s22, %s2671_s22 }
  0x16   :  { %p2678_p6 = por %p2677_p5, %p2676_p4 }
  0x18   :  { %p2679_p7 = pnand %p2678_p6, %p2672_p3 }
  0x1a   :  { %2682 = shalt.err (!%p2679_p7)
}
  0x1b   :  { %s2964_s2 = smov 192   ;;  %s2965_s23 = smov 12  }
  0x1c   :  { %60 = dma.hbm_to_vmem [thread:$0]  %s3556_s4, 3072, %s55_s28, [#allocation6], %s2964_s2, %s2964_s2, %s2965_s23  }
  0x1d   :  { %s2966_s26 = smov [#allocation8]   ;;  %s2967_s29 = smov [#allocation11]  }
  0x1e   :  { %s81_s27 = sshll.u32 %s2966_s26, 4  ;;  %s101_s30 = sshll.u32 %s2967_s29, 4  ;;  %s82_s27 = int_to_ptr.vmem [resolvable:$true] %s81_s27  ;;  %s102_s30 = int_to_ptr.vmem [resolvable:$true] %s101_s30 }
  0x1f   :  { %s2683_s1 = scalar_lea.hbm %s3559_s7, 16 }
  0x20   :  { %p2684_p8 = scmp.ne.s32.totalorder %s3559_s7, %s2683_s1  ;;  %p2687_p9 = scmp.lt.u32.totalorder %s2683_s1, %s3559_s7 }
  0x22   :  { %p2689_p10 = pnand %p2687_p9, %p2684_p8 }
  0x24   :  { %2692 = shalt.err (!%p2689_p10)
}
  0x25   :  { %s2693_s4 = scalar_lea.vmem %s82_s27, 16  ;;  %s2697_s28 = scalar_lea.vmem %s82_s27, 32 }
  0x26   :  { %p2694_p11 = scmp.ne.s32.totalorder %s82_s27, %s2693_s4  ;;  %p2698_p12 = scmp.lt.s32.totalorder %s82_s27, %s82_s27 }
  0x27   :  { %p2699_p13 = scmp.lt.s32.totalorder %s2697_s28, %s2693_s4 }
  0x29   :  { %p2700_p0 = por %p2699_p13, %p2698_p12 }
  0x2b   :  { %p2701_p1 = pnand %p2700_p0, %p2694_p11 }
  0x2d   :  { %2704 = shalt.err (!%p2701_p1)
}
  0x2e   :  { %84 = dma.hbm_to_vmem [thread:$0]  %s3559_s7, 16, %s82_s27, [#allocation9]  }
  0x2f   :  { %s2705_s18 = scalar_lea.hbm %s3561_s9, 16 }
  0x30   :  { %p2706_p2 = scmp.ne.s32.totalorder %s3561_s9, %s2705_s18  ;;  %p2709_p3 = scmp.lt.u32.totalorder %s2705_s18, %s3561_s9 }
  0x32   :  { %p2711_p4 = pnand %p2709_p3, %p2706_p2 }
  0x34   :  { %2714 = shalt.err (!%p2711_p4)
}
  0x35   :  { %s2715_s1 = scalar_lea.vmem %s102_s30, 16  ;;  %s2719_s20 = scalar_lea.vmem %s102_s30, 32 }
  0x36   :  { %p2716_p5 = scmp.ne.s32.totalorder %s102_s30, %s2715_s1  ;;  %p2720_p6 = scmp.lt.s32.totalorder %s102_s30, %s102_s30 }
  0x37   :  { %p2721_p7 = scmp.lt.s32.totalorder %s2719_s20, %s2715_s1 }
  0x39   :  { %p2722_p8 = por %p2721_p7, %p2720_p6 }
  0x3b   :  { %p2723_p9 = pnand %p2722_p8, %p2716_p5 }
  0x3d   :  { %2726 = shalt.err (!%p2723_p9)
}
  0x3e   :  { %104 = dma.hbm_to_vmem [thread:$0]  %s3561_s9, 16, %s102_s30, [#allocation12]  }
  0x3f   :  { %s2968_s21 = smov [#allocation14]   ;;  %s2969_s4 = smov [#allocation17]  }
  0x40   :  { %s123_s22 = sshll.u32 %s2968_s21, 4  ;;  %s145_s28 = sshll.u32 %s2969_s4, 4  ;;  %s124_s22 = int_to_ptr.vmem [resolvable:$true] %s123_s22  ;;  %s146_s28 = int_to_ptr.vmem [resolvable:$true] %s145_s28 }
  0x41   :  { %s2727_s24 = scalar_lea.hbm %s3563_s11, 16 }
  0x42   :  { %p2728_p10 = scmp.ne.s32.totalorder %s3563_s11, %s2727_s24  ;;  %p2731_p11 = scmp.lt.u32.totalorder %s2727_s24, %s3563_s11 }
  0x44   :  { %p2733_p12 = pnand %p2731_p11, %p2728_p10 }
  0x46   :  { %2736 = shalt.err (!%p2733_p12)
}
  0x47   :  { %s2737_s9 = scalar_lea.vmem %s124_s22, 16  ;;  %s2741_s30 = scalar_lea.vmem %s124_s22, 32 }
  0x48   :  { %p2738_p13 = scmp.ne.s32.totalorder %s124_s22, %s2737_s9  ;;  %p2742_p0 = scmp.lt.s32.totalorder %s124_s22, %s124_s22 }
  0x49   :  { %p2743_p1 = scmp.lt.s32.totalorder %s2741_s30, %s2737_s9 }
  0x4b   :  { %p2744_p2 = por %p2743_p1, %p2742_p0 }
  0x4d   :  { %p2745_p3 = pnand %p2744_p2, %p2738_p13 }
  0x4f   :  { %2748 = shalt.err (!%p2745_p3)
}
  0x50   :  { %126 = dma.hbm_to_vmem [thread:$0]  %s3563_s11, 16, %s124_s22, [#allocation15]  }
  0x51   :  { %s2749_s7 = scalar_lea.hbm %s3565_s13, 16 }
  0x52   :  { %p2750_p4 = scmp.ne.s32.totalorder %s3565_s13, %s2749_s7  ;;  %p2753_p5 = scmp.lt.u32.totalorder %s2749_s7, %s3565_s13 }
  0x54   :  { %p2755_p6 = pnand %p2753_p5, %p2750_p4 }
  0x56   :  { %2758 = shalt.err (!%p2755_p6)
}
  0x57   :  { %s2759_s23 = scalar_lea.vmem %s146_s28, 16  ;;  %s2763_s24 = scalar_lea.vmem %s146_s28, 32 }
  0x58   :  { %p2760_p7 = scmp.ne.s32.totalorder %s146_s28, %s2759_s23  ;;  %p2764_p8 = scmp.lt.s32.totalorder %s146_s28, %s146_s28 }
  0x59   :  { %p2765_p9 = scmp.lt.s32.totalorder %s2763_s24, %s2759_s23 }
  0x5b   :  { %p2766_p10 = por %p2765_p9, %p2764_p8 }
  0x5d   :  { %p2767_p11 = pnand %p2766_p10, %p2760_p7 }
  0x5f   :  { %2770 = shalt.err (!%p2767_p11)
}
  0x60   :  { %148 = dma.hbm_to_vmem [thread:$0]  %s3565_s13, 16, %s146_s28, [#allocation18]  }
  0x61   :  { %s2970_s25 = smov [#allocation2]   ;;  %s2771_s9 = scalar_lea.hbm %s3555_s3, 256 }
  0x62   :  { %s42_s18 = sshll.u32 %s2970_s25, 4  ;;  %p2772_p12 = scmp.ne.s32.totalorder %s3555_s3, %s2771_s9  ;;  %s43_s18 = int_to_ptr.vmem [resolvable:$true] %s42_s18 }
  0x63   :  { %p2775_p13 = scmp.lt.u32.totalorder %s2771_s9, %s3555_s3 }
  0x65   :  { %p2777_p0 = pnand %p2775_p13, %p2772_p12 }
  0x67   :  { %2780 = shalt.err (!%p2777_p0)
}
  0x68   :  { %s2781_s20 = scalar_lea.vmem %s43_s18, 256  ;;  %p2786_p2 = scmp.lt.s32.totalorder %s43_s18, %s43_s18 }
  0x69   :  { %p2782_p1 = scmp.ne.s32.totalorder %s43_s18, %s2781_s20  ;;  %p2787_p3 = scmp.lt.s32.totalorder %s2781_s20, %s2781_s20 }
  0x6b   :  { %p2788_p4 = por %p2787_p3, %p2786_p2 }
  0x6d   :  { %p2789_p5 = pnand %p2788_p4, %p2782_p1 }
  0x6f   :  { %2792 = shalt.err (!%p2789_p5)
}
  0x70   :  { %s2971_s13 = smov 128   ;;  %s2972_s28 = smov 8  }
  0x71   :  { %48 = dma.hbm_to_vmem [thread:$0]  %s3555_s3, 256, %s43_s18, [#allocation3], %s2971_s13, %s2971_s13, %s2972_s28  }
  0x72   :  { %s2973_s21 = smov [#allocation7]   ;;  %s2793_s24 = scalar_lea.hbm %s3558_s6, 1024 }
  0x73   :  { %s68_s4 = sshll.u32 %s2973_s21, 4  ;;  %p2794_p6 = scmp.ne.s32.totalorder %s3558_s6, %s2793_s24  ;;  %s69_s4 = int_to_ptr.vmem [resolvable:$true] %s68_s4 }
  0x74   :  { %p2797_p7 = scmp.lt.u32.totalorder %s2793_s24, %s3558_s6 }
  0x76   :  { %p2799_p8 = pnand %p2797_p7, %p2794_p6 }
  0x78   :  { %2802 = shalt.err (!%p2799_p8)
}
  0x79   :  { %s2803_s29 = scalar_lea.vmem %s69_s4, 1024  ;;  %p2808_p10 = scmp.lt.s32.totalorder %s69_s4, %s69_s4 }
  0x7a   :  { %p2804_p9 = scmp.ne.s32.totalorder %s69_s4, %s2803_s29  ;;  %p2809_p11 = scmp.lt.s32.totalorder %s2803_s29, %s2803_s29 }
  0x7c   :  { %p2810_p12 = por %p2809_p11, %p2808_p10 }
  0x7e   :  { %p2811_p13 = pnand %p2810_p12, %p2804_p9 }
  0x80   :  { %2814 = shalt.err (!%p2811_p13)
}
  0x81   :  { %s2974_s3 = smov 64   ;;  %s2975_s18 = smov 4  }
  0x82   :  { %74 = dma.hbm_to_vmem [thread:$0]  %s3558_s6, 1024, %s69_s4, [#allocation6], %s2974_s3, %s2974_s3, %s2975_s18  }
  0x83   :  { %s2976_s0 = smov [#allocation10]   ;;  %s2977_s1 = smov [#allocation13]  }
  0x84   :  { %s91_s19 = sshll.u32 %s2976_s0, 4  ;;  %s110_s20 = sshll.u32 %s2977_s1, 4  ;;  %s92_s19 = int_to_ptr.vmem [resolvable:$true] %s91_s19  ;;  %s111_s20 = int_to_ptr.vmem [resolvable:$true] %s110_s20 }
  0x85   :  { %s2815_s21 = scalar_lea.hbm %s3560_s8, 16 }
  0x86   :  { %p2816_p0 = scmp.ne.s32.totalorder %s3560_s8, %s2815_s21  ;;  %p2819_p1 = scmp.lt.u32.totalorder %s2815_s21, %s3560_s8 }
  0x88   :  { %p2821_p2 = pnand %p2819_p1, %p2816_p0 }
  0x8a   :  { %2824 = shalt.err (!%p2821_p2)
}
  0x8b   :  { %s2825_s6 = scalar_lea.vmem %s92_s19, 16  ;;  %s2829_s4 = scalar_lea.vmem %s92_s19, 32 }
  0x8c   :  { %p2826_p3 = scmp.ne.s32.totalorder %s92_s19, %s2825_s6  ;;  %p2830_p4 = scmp.lt.s32.totalorder %s92_s19, %s92_s19 }
  0x8d   :  { %p2831_p5 = scmp.lt.s32.totalorder %s2829_s4, %s2825_s6 }
  0x8f   :  { %p2832_p6 = por %p2831_p5, %p2830_p4 }
  0x91   :  { %p2833_p7 = pnand %p2832_p6, %p2826_p3 }
  0x93   :  { %2836 = shalt.err (!%p2833_p7)
}
  0x94   :  { %94 = dma.hbm_to_vmem [thread:$0]  %s3560_s8, 16, %s92_s19, [#allocation9]  }
  0x95   :  { %s2837_s9 = scalar_lea.hbm %s3562_s10, 1024 }
  0x96   :  { %p2838_p8 = scmp.ne.s32.totalorder %s3562_s10, %s2837_s9  ;;  %p2841_p9 = scmp.lt.u32.totalorder %s2837_s9, %s3562_s10 }
  0x98   :  { %p2843_p10 = pnand %p2841_p9, %p2838_p8 }
  0x9a   :  { %2846 = shalt.err (!%p2843_p10)
}
  0x9b   :  { %s2847_s27 = scalar_lea.vmem %s111_s20, 1024  ;;  %p2852_p12 = scmp.lt.s32.totalorder %s111_s20, %s111_s20 }
  0x9c   :  { %p2848_p11 = scmp.ne.s32.totalorder %s111_s20, %s2847_s27  ;;  %p2853_p13 = scmp.lt.s32.totalorder %s2847_s27, %s2847_s27 }
  0x9e   :  { %p2854_p0 = por %p2853_p13, %p2852_p12 }
  0xa0   :  { %p2855_p1 = pnand %p2854_p0, %p2848_p11 }
  0xa2   :  { %2858 = shalt.err (!%p2855_p1)
}
  0xa3   :  { %116 = dma.hbm_to_vmem [thread:$0]  %s3562_s10, 1024, %s111_s20, [#allocation12], %s2974_s3, %s2974_s3, %s2975_s18  }
  0xa4   :  { %s2978_s21 = smov [#allocation16]   ;;  %s2979_s23 = smov [#allocation19]  }
  0xa5   :  { %s132_s2 = sshll.u32 %s2978_s21, 4  ;;  %s155_s24 = sshll.u32 %s2979_s23, 4  ;;  %s133_s2 = int_to_ptr.vmem [resolvable:$true] %s132_s2  ;;  %s156_s24 = int_to_ptr.vmem [resolvable:$true] %s155_s24 }
  0xa6   :  { %s2859_s4 = scalar_lea.hbm %s3564_s12, 1024 }
  0xa7   :  { %p2860_p2 = scmp.ne.s32.totalorder %s3564_s12, %s2859_s4  ;;  %p2863_p3 = scmp.lt.u32.totalorder %s2859_s4, %s3564_s12 }
  0xa9   :  { %p2865_p4 = pnand %p2863_p3, %p2860_p2 }
  0xab   :  { %2868 = shalt.err (!%p2865_p4)
}
  0xac   :  { %s2869_s10 = scalar_lea.vmem %s133_s2, 1024  ;;  %p2874_p6 = scmp.lt.s32.totalorder %s133_s2, %s133_s2 }
  0xad   :  { %p2870_p5 = scmp.ne.s32.totalorder %s133_s2, %s2869_s10  ;;  %p2875_p7 = scmp.lt.s32.totalorder %s2869_s10, %s2869_s10 }
  0xaf   :  { %p2876_p8 = por %p2875_p7, %p2874_p6 }
  0xb1   :  { %p2877_p9 = pnand %p2876_p8, %p2870_p5 }
  0xb3   :  { %2880 = shalt.err (!%p2877_p9)
}
  0xb4   :  { %138 = dma.hbm_to_vmem [thread:$0]  %s3564_s12, 1024, %s133_s2, [#allocation15], %s2974_s3, %s2974_s3, %s2975_s18  }
  0xb5   :  { %s2881_s1 = scalar_lea.hbm %s3566_s14, 16 }
  0xb6   :  { %p2882_p10 = scmp.ne.s32.totalorder %s3566_s14, %s2881_s1  ;;  %p2885_p11 = scmp.lt.u32.totalorder %s2881_s1, %s3566_s14 }
  0xb8   :  { %p2887_p12 = pnand %p2885_p11, %p2882_p10 }
  0xba   :  { %2890 = shalt.err (!%p2887_p12)
}
  0xbb   :  { %s2891_s21 = scalar_lea.vmem %s156_s24, 16  ;;  %s2895_s23 = scalar_lea.vmem %s156_s24, 32 }
  0xbc   :  { %p2892_p13 = scmp.ne.s32.totalorder %s156_s24, %s2891_s21  ;;  %p2896_p0 = scmp.lt.s32.totalorder %s156_s24, %s156_s24 }
  0xbd   :  { %p2897_p1 = scmp.lt.s32.totalorder %s2895_s23, %s2891_s21 }
  0xbf   :  { %p2898_p2 = por %p2897_p1, %p2896_p0 }
  0xc1   :  { %p2899_p3 = pnand %p2898_p2, %p2892_p13 }
  0xc3   :  { %2902 = shalt.err (!%p2899_p3)
}
  0xc4   :  { %158 = dma.hbm_to_vmem [thread:$0]  %s3566_s14, 16, %s156_s24, [#allocation18]  }
  0xc5   :  { %s2980_s2 = smov [#allocation20]   ;;  %s2903_s22 = scalar_lea.hbm %s3567_s15, 16 }
  0xc6   :  { %s165_s11 = sshll.u32 %s2980_s2, 4  ;;  %p2904_p4 = scmp.ne.s32.totalorder %s3567_s15, %s2903_s22  ;;  %s166_s11 = int_to_ptr.vmem [resolvable:$true] %s165_s11 }
  0xc7   :  { %p2907_p5 = scmp.lt.u32.totalorder %s2903_s22, %s3567_s15 }
  0xc9   :  { %p2909_p6 = pnand %p2907_p5, %p2904_p4 }
  0xcb   :  { %2912 = shalt.err (!%p2909_p6)
}
  0xcc   :  { %s2913_s20 = scalar_lea.vmem %s166_s11, 16  ;;  %s2917_s14 = scalar_lea.vmem %s166_s11, 32 }
  0xcd   :  { %p2914_p7 = scmp.ne.s32.totalorder %s166_s11, %s2913_s20  ;;  %p2918_p8 = scmp.lt.s32.totalorder %s166_s11, %s166_s11 }
  0xce   :  { %p2919_p9 = scmp.lt.s32.totalorder %s2917_s14, %s2913_s20 }
  0xd0   :  { %p2920_p10 = por %p2919_p9, %p2918_p8 }
  0xd2   :  { %p2921_p11 = pnand %p2920_p10, %p2914_p7 }
  0xd4   :  { %2924 = shalt.err (!%p2921_p11)
}
  0xd5   :  { %168 = dma.hbm_to_vmem [thread:$0]  %s3567_s15, 16, %s166_s11, [#allocation21]  }
  0xd6   :  { %2947 = dma.done.wait [#allocation3], 256  }
  0xd7   :  { %2948 = vsyncadd [#allocation3], 4294967040 }
  0xd8   :  { %2949 = dma.done.wait [#allocation6], 4096  }
  0xd9   :  { %2950 = vsyncadd [#allocation6], 4294963200 }
  0xda   :  { %2951 = dma.done.wait [#allocation9], 32  }
  0xdb   :  { %2952 = vsyncadd [#allocation9], 4294967264 }
  0xdc   :  { %2953 = dma.done.wait [#allocation12], 1040  }
  0xdd   :  { %2954 = vsyncadd [#allocation12], 4294966256 }
  0xde   :  { %2955 = dma.done.wait [#allocation15], 1040  }
  0xdf   :  { %2956 = vsyncadd [#allocation15], 4294966256 }
  0xe0   :  { %2957 = dma.done.wait [#allocation18], 32  }
  0xe1   :  { %2958 = vsyncadd [#allocation18], 4294967264 }
  0xe2   :  { %2959 = dma.done.wait [#allocation21], 16  }
  0xe3   :  { %2960 = vsyncadd [#allocation21], 4294967280  ;;  %v2981_v0 = vmov 0   ;;  %v2982_v1 = vmov 0.0   ;;  %s3578_s0 = sld [smem:[#allocation31_spill]]  ;;  %s3579_s19 = sld [smem:[#allocation33_spill]]  ;;  %v212_v18 = vlaneseq }
  0xe4   :  { %2555 = vset.pattern.permute.xlu0 %v2981_v0  ;;  %2317 = vmatprep.subr.bf16.mxu0 %v2982_v1  ;;  %vm2983_vm0 = vmmov 0   ;;  %v2557_v5 = vld [vmem:[#allocation5 + $0x4] ss:$12 sps:$4 sm:$0xff]   ;;  %v2559_v6 = vld [vmem:[#allocation5] ss:$12 sps:$4 sm:$0xff]   ;;  %vm235_vm3 = vcmask 130048  }
  0xe5   :  { %490 = vmatprep.mubr.bf16.mxu1 %v2981_v0  ;;  %2319 = vmatprep.mubr.msk.bf16.mxu0 %vm2983_vm0, %v2982_v1  ;;  %v2561_v7 = vld [vmem:[#allocation5 + $0x1c] ss:$12 sps:$4 sm:$0xff]   ;;  %v2563_v8 = vld [vmem:[#allocation5 + $0x18] ss:$12 sps:$4 sm:$0xff]   ;;  %v2565_v9 = vld [vmem:[#allocation5 + $0x34] ss:$12 sps:$4 sm:$0xff]  }
  0xe6   :  { %458 = vmatprep.subr.bf16.mxu1 %v2557_v5  ;;  %v2567_v10 = vld [vmem:[#allocation5 + $0x30] ss:$12 sps:$4 sm:$0xff]   ;;  %v2569_v11 = vld [vmem:[#allocation5 + $0x4c] ss:$12 sps:$4 sm:$0xff]   ;;  %v2571_v12 = vld [vmem:[#allocation5 + $0x48] ss:$12 sps:$4 sm:$0xff]  }
  0xe7   :  { %459 = vmatpush1.bf16.msra.mxu1 %v2559_v6  ;;  %v2573_v13 = vld [vmem:[#allocation5 + $0x64] ss:$12 sps:$4 sm:$0xff]   ;;  %v2575_v14 = vld [vmem:[#allocation5 + $0x60] ss:$12 sps:$4 sm:$0xff]   ;;  %v2577_v15 = vld [vmem:[#allocation5 + $0x7c] ss:$12 sps:$4 sm:$0xff]  }
  0xe8   :  { %460 = vmatprep.subr.bf16.mxu1 %v2561_v7  ;;  %v2579_v16 = vld [vmem:[#allocation5 + $0x78] ss:$12 sps:$4 sm:$0xff]   ;;  %v2581_v17 = vld [vmem:[#allocation5 + $0x94] ss:$12 sps:$4 sm:$0xff]   ;;  %v213_v19 = vand.u32 127, %v212_v18  ;;  %v316_v45 = vshrl.u32 %v212_v18, 7 }
  0xe9   :  { %v210_v2 = vld [vmem:[%s3578_s0] sm:$0xff]  ;;  %v211_v3 = vld [vmem:[%s3578_s0 + $0x8] sm:$0xff]  ;;  %v2568_v27 = vld [vmem:[#allocation5 + $0x38] ss:$12 sps:$4 sm:$0xff]   ;;  %vm560_vm4 = vcmask 261120   ;;  %vm683_vm5 = vcmask 1043456  }
  0xea   :  { %215 = vperm.xlu0 %2555, %v210_v2   ;;  %v2556_v4 = vld [vmem:[%s3579_s19] sm:$0xff]   ;;  %v2572_v28 = vld [vmem:[#allocation5 + $0x50] ss:$12 sps:$4 sm:$0xff]   ;;  %v2584_v32 = vld [vmem:[#allocation5 + $0x98] ss:$12 sps:$4 sm:$0xff]   ;;  %v317_v46 = vsub.s32 0, %v316_v45 }
  0xeb   :  { %2318 = vmatpush3.bf16.msra.mxu0 %v2556_v4  ;;  %461 = vmatpush1.bf16.msra.mxu1 %v2563_v8  ;;  %v2560_v24 = vld [vmem:[#allocation5 + $0x8] ss:$12 sps:$4 sm:$0xff]   ;;  %v2564_v26 = vld [vmem:[#allocation5 + $0x20] ss:$12 sps:$4 sm:$0xff]   ;;  %v2583_v31 = vld [vmem:[#allocation5 + $0x90] ss:$12 sps:$4 sm:$0xff]  }
  0xec   :  { %2323 = vmatprep.subr.bf16.mxu0 %v2982_v1  ;;  %462 = vmatprep.subr.bf16.mxu1 %v2565_v9  ;;  %v2576_v29 = vld [vmem:[#allocation5 + $0x68] ss:$12 sps:$4 sm:$0xff]   ;;  %v2580_v30 = vld [vmem:[#allocation5 + $0x80] ss:$12 sps:$4 sm:$0xff]   ;;  %v2588_v35 = vld [vmem:[#allocation5 + $0xb0] ss:$12 sps:$4 sm:$0xff]  }
  0xed   :  { %v2585_v33 = vld [vmem:[#allocation5 + $0xac] ss:$12 sps:$4 sm:$0xff]   ;;  %v2587_v34 = vld [vmem:[#allocation5 + $0xa8] ss:$12 sps:$4 sm:$0xff]   ;;  %v325_v47 = vsub.s32 2, %v316_v45  ;;  %v321_v49 = vsub.s32 1, %v316_v45 }
  0xee   :  { %218 = vperm.xlu0 %2555, %v211_v3   ;;  %v227_v36 = vld [vmem:[#allocation2] sm:$0xff]  ;;  %v228_v38 = vld [vmem:[#allocation2 + $0x8] sm:$0xff]  ;;  %v313_v48 = vld [vmem:[%s3557_s5] sm:$0x7]  ;;  %s3580_s18 = sld [smem:[#allocation32_spill]]  ;;  %vm653_vm6 = vcmask 64512  }
  0xef   :  { %463 = vmatpush1.bf16.msra.mxu1 %v2567_v10  ;;  %v318_v50 = vrot.slane %v313_v48, %v317_v46  ;;  %v326_v51 = vrot.slane %v313_v48, %v325_v47  ;;  %v322_v52 = vrot.slane %v313_v48, %v321_v49  ;;  %s2984_s6 = smov 96   ;;  %s2985_s4 = smov 32  }
  0xf0   :  { %464 = vmatprep.subr.bf16.mxu1 %v2569_v11  ;;  %s2986_s19 = smov [#allocation22]  }
  0xf1   :  { %s2129_s21 = sshll.u32 %s2986_s19, 4  ;;  %s2130_s21 = int_to_ptr.vmem [resolvable:$true] %s2129_s21 }
  0xf2   :  { %s2925_s23 = scalar_lea.vmem %s2130_s21, 256  ;;  %p2930_p13 = scmp.lt.s32.totalorder %s2130_s21, %s2130_s21 }
  0xf3   :  { %465 = vmatpush1.bf16.msra.mxu1 %v2571_v12  ;;  %p2926_p12 = scmp.ne.s32.totalorder %s2130_s21, %s2925_s23  ;;  %p2931_p0 = scmp.lt.s32.totalorder %s2925_s23, %s2925_s23 }
  0xf4   :  { %466 = vmatprep.subr.bf16.mxu1 %v2573_v13  ;;  %v3309_v12 = vld [vmem:[%s3580_s18] ss:$0 sm:$0xff] }
  0xf5   :  { %p2932_p1 = por %p2931_p0, %p2930_p13 }
  0xf7   :  { %467 = vmatpush1.bf16.msra.mxu1 %v2575_v14  ;;  %p2933_p2 = pnand %p2932_p1, %p2926_p12 }
  0xf8   :  { %468 = vmatprep.subr.bf16.mxu1 %v2577_v15 }
  0xfb   :  { %469 = vmatpush1.bf16.msra.mxu1 %v2579_v16 }
  0xfc   :  { %470 = vmatprep.subr.bf16.mxu1 %v2581_v17 }
  0xff   :  { %471 = vmatpush1.bf16.msra.mxu1 %v2583_v31 }
 0x100   :  { %472 = vmatprep.subr.bf16.mxu1 %v2585_v33 }
 0x103   :  { %473 = vmatpush1.bf16.msra.mxu1 %v2587_v34 }
 0x104   :  { %2367 = vmatprep.subr.bf16.mxu1 %v2982_v1 }
 0x169   :  { %v216_v20 = vpop.permute.xlu0 %215 }
 0x16a   :  { %vm220_vm1 = vcmp.eq.s32.totalorder %v213_v19, %v216_v20 }
 0x16b   :  { %v222_v22 = vsel %vm220_vm1, 1.0, %v2982_v1 }
 0x16d   :  { %v219_v21 = vpop.permute.xlu0 %218 }
 0x16e   :  { %vm221_vm2 = vcmp.eq.s32.totalorder %v213_v19, %v219_v21  ;;  %v3316_v19 = vld [vmem:[%s3580_s18 + $0x1] ss:$0 sm:$0xff] }
 0x16f   :  { %v223_v23 = vsel %vm221_vm2, 1.0, %v2982_v1 }
 0x170   :  { %v224_v25 = vpack.c.bf16 %v223_v23, %v222_v22 }
 0x172   :  { %2320 = vmatmul.mubr.msk.bf16.vlgmr.msra.gmra.mrb[0].mxu0 %vm235_vm3, %v224_v25 }
 0x173   :  { %2324 = vmatpush3.bf16.msra.mxu0 %v2560_v24  ;;  %2339 = vmatprep.mubr.msk.bf16.mxu0 %vm2983_vm0, %v2982_v1 }
 0x174   :  { %2325 = vmatprep.subr.bf16.mxu0 %v2982_v1 }
 0x177   :  { %2326 = vmatpush3.bf16.msra.mxu0 %v2564_v26 }
 0x178   :  { %2327 = vmatprep.subr.bf16.mxu0 %v2982_v1 }
 0x17b   :  { %2328 = vmatpush3.bf16.msra.mxu0 %v2568_v27 }
 0x17c   :  { %2329 = vmatprep.subr.bf16.mxu0 %v2982_v1 }
 0x17f   :  { %2330 = vmatpush3.bf16.msra.mxu0 %v2572_v28 }
 0x180   :  { %2331 = vmatprep.subr.bf16.mxu0 %v2982_v1 }
 0x183   :  { %2332 = vmatpush3.bf16.msra.mxu0 %v2576_v29 }
 0x184   :  { %2333 = vmatprep.subr.bf16.mxu0 %v2982_v1 }
 0x187   :  { %2334 = vmatpush3.bf16.msra.mxu0 %v2580_v30 }
 0x188   :  { %2335 = vmatprep.subr.bf16.mxu0 %v2982_v1 }
 0x18b   :  { %2336 = vmatpush3.bf16.msra.mxu0 %v2584_v32 }
 0x18c   :  { %2337 = vmatprep.subr.bf16.mxu0 %v2982_v1 }
 0x18f   :  { %2338 = vmatpush3.bf16.msra.mxu0 %v2588_v35 }
 0x190   :  { %2343 = vmatprep.subr.bf16.mxu0 %v2982_v1 }
 0x245   :  { %v273_v37 = vpop.f32.mrb[0].mxu0 }
 0x246   :  { %v2321_v39 = vpop.f32.mrb[1].mxu0  ;;  %v3264_v41 = vadd.f32 %v273_v37, %v227_v36 }
 0x247   :  { %v276_v40 = vpop.f32.mrb[2].mxu0 }
 0x248   :  { %v3266_v42 = vadd.f32 %v276_v40, %v228_v38  ;;  %v2322_v43 = vpop.f32.mrb[3].mxu0 }
 0x24a   :  { %v280_v44 = vpack.c.bf16 %v3266_v42, %v3264_v41 }
 0x24c   :  { %491 = vmatmul.mubr.bf16.vlgmr.msra.gmra.mrb[0].mxu1 %v280_v44  ;;  %2340 = vmatmul.mubr.bf16.vlgmr.msra.gmra.mrb[4].mxu0 %v280_v44 }
 0x24d   :  { %2345 = vmatprep.mubr.msk.bf16.mxu0 %vm2983_vm0, %v2982_v1  ;;  %2369 = vmatprep.mubr.msk.bf16.mxu1 %vm2983_vm0, %v2982_v1 }
 0x31f   :  { %v492_v53 = vpop.f32.mrb[0].mxu1  ;;  %v535_v54 = vpop.f32.mrb[4].mxu0 }
 0x320   :  { %v493_v55 = vadd.f32 %v492_v53, %v318_v50  ;;  %v536_v56 = vadd.f32 %v535_v54, %v326_v51  ;;  %v494_v57 = vpop.f32.mrb[1].mxu1  ;;  %v2341_v58 = vpop.f32.mrb[5].mxu0 }
 0x321   :  { %v495_v59 = vadd.f32 %v494_v57, %v322_v52  ;;  %v496_v60 = vpop.f32.mrb[2].mxu1  ;;  %v538_v61 = vpop.f32.mrb[6].mxu0 }
 0x322   :  { %v497_v62 = vadd.f32 %v496_v60, %v318_v50  ;;  %v3277_v63 = vadd.f32 %v538_v61, %v326_v51  ;;  %v498_v0 = vpop.f32.mrb[3].mxu1  ;;  %v2342_v2 = vpop.f32.mrb[7].mxu0  ;;  %v3286_v7 = vpack.c.bf16 %v493_v55, %v493_v55  ;;  %v3295_v9 = vpack.c.bf16 %v536_v56, %v536_v56 }
 0x323   :  { %v3279_v3 = vpack.c.bf16 %v495_v59, %v495_v59  ;;  %v499_v4 = vadd.f32 %v498_v0, %v322_v52 }
 0x324   :  { %v3297_v10 = vpack.c.bf16 %v497_v62, %v497_v62  ;;  %v685_v11 = vsel %vm683_vm5, %v3295_v9, 0  ;;  %v3334_v44 = vpack.c.bf16 %v3277_v63, %v3277_v63 }
 0x325   :  { %v565_v5 = vsel %vm560_vm4, %v3279_v3, 0  ;;  %v3284_v6 = vpack.c.bf16 %v499_v4, %v499_v4 }
 0x326   :  { %2344 = vmatpush3.bf16.xpose.msra.mxu0 %v565_v5  ;;  %v731_v48 = vsel %vm683_vm5, %v3334_v44, 0 }
 0x327   :  { %2349 = vmatprep.subr.bf16.mxu0 %v2982_v1  ;;  %v611_v8 = vsel %vm560_vm4, %v3284_v6, 0 }
 0x32d   :  { %2346 = vmatmul.mubr.msk.bf16.vlgmr.msra.gmra.mrb[8].mxu0 %vm560_vm4, %v3286_v7 }
 0x32e   :  { %2350 = vmatpush3.bf16.xpose.msra.mxu0 %v611_v8  ;;  %2351 = vmatprep.mubr.msk.bf16.mxu0 %vm2983_vm0, %v2982_v1 }
 0x32f   :  { %2355 = vmatprep.subr.bf16.mxu0 %v2982_v1 }
 0x335   :  { %2352 = vmatmul.mubr.msk.bf16.vlgmr.msra.gmra.mrb[12].mxu0 %vm560_vm4, %v3297_v10 }
 0x336   :  { %2356 = vmatpush3.bf16.msra.mxu0 %v685_v11  ;;  %2357 = vmatprep.mubr.msk.bf16.mxu0 %vm2983_vm0, %v2982_v1 }
 0x337   :  { %2361 = vmatprep.subr.bf16.mxu0 %v2982_v1 }
 0x400   :  { %v601_v13 = vpop.f32.mrb[8].mxu0 }
 0x401   :  { %v602_v14 = vadd.f32 %v3309_v12, %v601_v13  ;;  %v2347_v15 = vpop.f32.mrb[9].mxu0 }
 0x402   :  { %v604_v16 = vpop.f32.mrb[10].mxu0 }
 0x403   :  { %v2348_v17 = vpop.f32.mrb[11].mxu0  ;;  %v654_v18 = vsel %vm653_vm6, %v602_v14, -inf }
 0x404   :  { %655 = vmax.xlane.f32.xlu1 %v654_v18 }
 0x408   :  { %v647_v20 = vpop.f32.mrb[12].mxu0 }
 0x409   :  { %v648_v21 = vadd.f32 %v3316_v19, %v647_v20  ;;  %v2353_v22 = vpop.f32.mrb[13].mxu0 }
 0x40a   :  { %v650_v23 = vpop.f32.mrb[14].mxu0 }
 0x40b   :  { %v2354_v24 = vpop.f32.mrb[15].mxu0  ;;  %v657_v25 = vsel %vm653_vm6, %v648_v21, -inf }
 0x40c   :  { %658 = vmax.xlane.f32.xlu1 %v657_v25 }
 0x41d   :  { %782 = vrot.lane.b32.xlu1 %v3279_v3, %s2984_s6 }
 0x421   :  { %834 = vrot.lane.b32.xlu1 %v3284_v6, %s2984_s6 }
 0x491   :  { %v656_v26 = vpop.xlane.xlu1 %655 }
 0x492   :  { %v660_v27 = vsub.f32 %v602_v14, %v656_v26 }
 0x494   :  { %v662_v28 = vmul.f32 1.442695, %v660_v27 }
 0x496   :  { %2621 = vpow2.f32 %v662_v28 }
 0x499   :  { %v659_v29 = vpop.xlane.xlu1 %658 }
 0x49a   :  { %v661_v30 = vsub.f32 %v648_v21, %v659_v29 }
 0x49c   :  { %v664_v31 = vmul.f32 1.442695, %v661_v30 }
 0x49d   :  { %v783_v32 = vpop.permute.xlu1 %782 }
 0x49e   :  { %2623 = vpow2.f32 %v664_v31  ;;  %v788_v33 = vsel %vm560_vm4, %v783_v32, 0 }
 0x49f   :  { %2368 = vmatpush3.bf16.xpose.msra.mxu1 %v788_v33 }
 0x4a0   :  { %v2622_v34 = vpop.eup %2621  ;;  %2379 = vmatprep.subr.bf16.mxu1 %v2982_v1 }
 0x4a1   :  { %v666_v35 = vsel %vm653_vm6, %v2622_v34, 0.0  ;;  %v835_v39 = vpop.permute.xlu1 %834 }
 0x4a2   :  { %667 = vadd.xlane.f32.xlu0 %v666_v35  ;;  %v840_v52 = vsel %vm560_vm4, %v835_v39, 0 }
 0x4a8   :  { %v2624_v36 = vpop.eup %2623 }
 0x4a9   :  { %v669_v37 = vsel %vm653_vm6, %v2624_v36, 0.0 }
 0x4aa   :  { %670 = vadd.xlane.f32.xlu1 %v669_v37 }
 0x4bb   :  { %779 = vrot.lane.b32.xlu1 %v3286_v7, %s2984_s6 }
 0x4bf   :  { %831 = vrot.lane.b32.xlu1 %v3297_v10, %s2984_s6 }
 0x52f   :  { %v668_v38 = vpop.xlane.xlu0 %667 }
 0x530   :  { %2625 = vrcp.f32 %v668_v38 }
 0x537   :  { %v671_v40 = vpop.xlane.xlu1 %670 }
 0x538   :  { %2627 = vrcp.f32 %v671_v40  ;;  %v2589_v40 = vld [vmem:[#allocation7] sm:$0xff]  }
 0x53a   :  { %v2626_v43 = vpop.eup %2625 }
 0x53b   :  { %v674_v45 = vmul.f32 %v2626_v43, %v2622_v34  ;;  %v780_v46 = vpop.permute.xlu1 %779 }
 0x53c   :  { %2370 = vmatmul.mubr.msk.bf16.vlgmr.msra.gmra.mrb[4].mxu1 %vm560_vm4, %v780_v46 }
 0x53d   :  { %v676_v47 = vpack.c.bf16 %v674_v45, %v674_v45  ;;  %2381 = vmatprep.mubr.msk.bf16.mxu1 %vm2983_vm0, %v2982_v1  ;;  %v2590_v45 = vld [vmem:[#allocation7 + $0x8] sm:$0xff]  }
 0x53f   :  { %2358 = vmatmul.mubr.msk.bf16.vlgmr.msra.gmra.mrb[16].mxu0 %vm653_vm6, %v676_v47  ;;  %v832_v53 = vpop.permute.xlu1 %831 }
 0x540   :  { %2362 = vmatpush3.bf16.msra.mxu0 %v731_v48  ;;  %2363 = vmatprep.mubr.msk.bf16.mxu0 %vm2983_vm0, %v2982_v1 }
 0x541   :  { %2373 = vmatprep.subr.bf16.mxu0 %v2982_v1 }
 0x542   :  { %v2628_v49 = vpop.eup %2627 }
 0x543   :  { %v675_v50 = vmul.f32 %v2628_v49, %v2624_v36 }
 0x545   :  { %v677_v51 = vpack.c.bf16 %v675_v50, %v675_v50 }
 0x547   :  { %2364 = vmatmul.mubr.msk.bf16.vlgmr.msra.gmra.mrb[20].mxu0 %vm653_vm6, %v677_v51  ;;  %v2591_v51 = vld [vmem:[#allocation7 + $0x10] sm:$0xff]  }
 0x548   :  { %2375 = vmatprep.mubr.msk.bf16.mxu0 %vm2983_vm0, %v2982_v1 }
 0x549   :  { %2374 = vmatpush3.bf16.xpose.msra.mxu0 %v840_v52  ;;  %v2592_v52 = vld [vmem:[#allocation7 + $0x18] sm:$0xff]  }
 0x54a   :  { %2385 = vmatprep.subr.bf16.mxu0 %v2982_v1 }
 0x550   :  { %2376 = vmatmul.mubr.msk.bf16.vlgmr.msra.gmra.mrb[24].mxu0 %vm560_vm4, %v832_v53 }
 0x551   :  { %2387 = vmatprep.mubr.msk.bf16.mxu0 %vm2983_vm0, %v2982_v1 }
 0x60f   :  { %v824_v54 = vpop.f32.mrb[4].mxu1 }
 0x610   :  { %v825_v55 = vadd.f32 %v3309_v12, %v824_v54  ;;  %v2371_v56 = vpop.f32.mrb[5].mxu1 }
 0x611   :  { %v827_v57 = vpop.f32.mrb[6].mxu1 }
 0x612   :  { %v3354_v58 = vpop.f32.mrb[16].mxu0  ;;  %v2372_v59 = vpop.f32.mrb[7].mxu1  ;;  %v882_v60 = vsel %vm653_vm6, %v825_v55, -inf }
 0x613   :  { %883 = vmax.xlane.f32.xlu0 %v882_v60  ;;  %v2359_v61 = vpop.f32.mrb[17].mxu0 }
 0x614   :  { %v724_v62 = vpop.f32.mrb[18].mxu0 }
 0x615   :  { %v2360_v63 = vpop.f32.mrb[19].mxu0 }
 0x61a   :  { %v767_v0 = vpop.f32.mrb[20].mxu0 }
 0x61b   :  { %v773_v2 = vpack.c.bf16 %v767_v0, %v3354_v58  ;;  %v2365_v4 = vpop.f32.mrb[21].mxu0 }
 0x61c   :  { %v770_v5 = vpop.f32.mrb[22].mxu0 }
 0x61d   :  { %v2366_v8 = vpop.f32.mrb[23].mxu0 }
 0x623   :  { %v876_v11 = vpop.f32.mrb[24].mxu0 }
 0x624   :  { %v877_v13 = vadd.f32 %v3316_v19, %v876_v11  ;;  %v2377_v14 = vpop.f32.mrb[25].mxu0 }
 0x625   :  { %v879_v15 = vpop.f32.mrb[26].mxu0 }
 0x626   :  { %v2378_v16 = vpop.f32.mrb[27].mxu0  ;;  %v885_v17 = vsel %vm653_vm6, %v877_v13, -inf }
 0x627   :  { %886 = vmax.xlane.f32.xlu1 %v885_v17 }
 0x638   :  { %1173 = vrot.lane.b32.xlu1 %v3284_v6, %s2974_s3 }
 0x6a0   :  { %v884_v18 = vpop.xlane.xlu0 %883 }
 0x6a1   :  { %v888_v20 = vsub.f32 %v825_v55, %v884_v18 }
 0x6a3   :  { %v890_v21 = vmul.f32 1.442695, %v888_v20 }
 0x6a5   :  { %2629 = vpow2.f32 %v890_v21 }
 0x6af   :  { %v2630_v22 = vpop.eup %2629 }
 0x6b0   :  { %v894_v23 = vsel %vm653_vm6, %v2630_v22, 0.0 }
 0x6b1   :  { %895 = vadd.xlane.f32.xlu0 %v894_v23 }
 0x6b4   :  { %v887_v24 = vpop.xlane.xlu1 %886 }
 0x6b5   :  { %v889_v25 = vsub.f32 %v877_v13, %v887_v24 }
 0x6b7   :  { %v892_v26 = vmul.f32 1.442695, %v889_v25 }
 0x6b8   :  { %v1174_v47 = vpop.permute.xlu1 %1173 }
 0x6b9   :  { %2631 = vpow2.f32 %v892_v26  ;;  %v1179_v48 = vsel %vm560_vm4, %v1174_v47, 0 }
 0x6c3   :  { %v2632_v27 = vpop.eup %2631 }
 0x6c4   :  { %v897_v28 = vsel %vm653_vm6, %v2632_v27, 0.0 }
 0x6c7   :  { %907 = vrot.lane.b32.xlu0 %v3295_v9, %s2984_s6 }
 0x6e6   :  { %898 = vadd.xlane.f32.xlu0 %v897_v28 }
 0x6fc   :  { %956 = vrot.lane.b32.xlu0 %v3334_v44, %s2984_s6 }
 0x700   :  { %1123 = vrot.lane.b32.xlu0 %v3279_v3, %s2974_s3 }
 0x704   :  { %1121 = vrot.lane.b32.xlu0 %v3286_v7, %s2974_s3 }
 0x708   :  { %1171 = vrot.lane.b32.xlu0 %v3297_v10, %s2974_s3 }
 0x73e   :  { %v896_v29 = vpop.xlane.xlu0 %895 }
 0x73f   :  { %2633 = vrcp.f32 %v896_v29 }
 0x742   :  { %v908_v30 = vpop.permute.xlu0 %907 }
 0x743   :  { %v913_v31 = vsel %vm683_vm5, %v908_v30, 0 }
 0x744   :  { %2380 = vmatpush3.bf16.msra.mxu1 %v913_v31 }
 0x745   :  { %2391 = vmatprep.subr.bf16.mxu1 %v2982_v1 }
 0x749   :  { %v2634_v32 = vpop.eup %2633 }
 0x74a   :  { %v902_v33 = vmul.f32 %v2634_v32, %v2630_v22 }
 0x74c   :  { %v904_v34 = vpack.c.bf16 %v902_v33, %v902_v33 }
 0x74e   :  { %2382 = vmatmul.mubr.msk.bf16.vlgmr.msra.gmra.mrb[8].mxu1 %vm653_vm6, %v904_v34 }
 0x74f   :  { %2395 = vmatprep.mubr.msk.bf16.mxu1 %vm2983_vm0, %v2982_v1  ;;  %2392 = vmatpush3.bf16.msra.mxu1 %v2591_v51 }
 0x750   :  { %2393 = vmatprep.subr.bf16.mxu1 %v2982_v1 }
 0x753   :  { %2394 = vmatpush3.bf16.msra.mxu1 %v2592_v52 }
 0x754   :  { %2407 = vmatprep.subr.bf16.mxu1 %v2982_v1 }
 0x773   :  { %v899_v35 = vpop.xlane.xlu0 %898 }
 0x774   :  { %2635 = vrcp.f32 %v899_v35 }
 0x777   :  { %v957_v36 = vpop.permute.xlu0 %956 }
 0x778   :  { %v962_v37 = vsel %vm683_vm5, %v957_v36, 0 }
 0x779   :  { %2386 = vmatpush3.bf16.msra.mxu0 %v962_v37 }
 0x77a   :  { %2399 = vmatprep.subr.bf16.mxu0 %v2982_v1 }
 0x77b   :  { %v1124_v46 = vpop.permute.xlu0 %1123 }
 0x77c   :  { %v1129_v61 = vsel %vm560_vm4, %v1124_v46, 0 }
 0x77e   :  { %v2636_v38 = vpop.eup %2635 }
 0x77f   :  { %v903_v39 = vmul.f32 %v2636_v38, %v2632_v27  ;;  %v1122_v49 = vpop.permute.xlu0 %1121 }
 0x781   :  { %v905_v43 = vpack.c.bf16 %v903_v39, %v903_v39 }
 0x783   :  { %2388 = vmatmul.mubr.msk.bf16.vlgmr.msra.gmra.mrb[28].mxu0 %vm653_vm6, %v905_v43  ;;  %v1172_v50 = vpop.permute.xlu0 %1171 }
 0x784   :  { %2400 = vmatpush3.bf16.msra.mxu0 %v2589_v40  ;;  %2403 = vmatprep.mubr.msk.bf16.mxu0 %vm2983_vm0, %v2982_v1 }
 0x785   :  { %2401 = vmatprep.subr.bf16.mxu0 %v2982_v1 }
 0x788   :  { %2402 = vmatpush3.bf16.msra.mxu0 %v2590_v45 }
 0x789   :  { %2413 = vmatprep.subr.bf16.mxu0 %v2982_v1 }
 0x78b   :  { %2404 = vmatmul.mubr.msk.bf16.vlgmr.msra.gmra.mrb[32].mxu0 %vm560_vm4, %v773_v2 }
 0x78c   :  { %2415 = vmatprep.mubr.msk.bf16.mxu0 %vm2983_vm0, %v2982_v1 }
 0x791   :  { %2414 = vmatpush3.bf16.xpose.msra.mxu0 %v1179_v48 }
 0x792   :  { %2425 = vmatprep.subr.bf16.mxu0 %v2982_v1 }
 0x798   :  { %2416 = vmatmul.mubr.msk.bf16.vlgmr.msra.gmra.mrb[36].mxu0 %vm560_vm4, %v1172_v50 }
 0x799   :  { %2427 = vmatprep.mubr.msk.bf16.mxu0 %vm2983_vm0, %v2982_v1 }
 0x821   :  { %v949_v53 = vpop.f32.mrb[8].mxu1 }
 0x822   :  { %v2383_v54 = vpop.f32.mrb[9].mxu1 }
 0x823   :  { %v952_v55 = vpop.f32.mrb[10].mxu1  ;;  %v2593_v54 = vld [vmem:[#allocation7 + $0x20] sm:$0xff]  }
 0x824   :  { %v2384_v56 = vpop.f32.mrb[11].mxu1 }
 0x825   :  { %v2594_v56 = vld [vmem:[#allocation7 + $0x28] sm:$0xff]  }
 0x856   :  { %v998_v57 = vpop.f32.mrb[28].mxu0 }
 0x857   :  { %v1004_v58 = vpack.c.bf16 %v998_v57, %v949_v53  ;;  %v2389_v59 = vpop.f32.mrb[29].mxu0 }
 0x858   :  { %v1001_v60 = vpop.f32.mrb[30].mxu0 }
 0x859   :  { %v2390_v62 = vpop.f32.mrb[31].mxu0  ;;  %2396 = vmatmul.mubr.msk.bf16.vlgmr.msra.gmra.mrb[12].mxu1 %vm560_vm4, %v1004_v58 }
 0x85a   :  { %2408 = vmatpush3.bf16.xpose.msra.mxu1 %v1129_v61  ;;  %2409 = vmatprep.mubr.msk.bf16.mxu1 %vm2983_vm0, %v2982_v1 }
 0x85b   :  { %2419 = vmatprep.subr.bf16.mxu1 %v2982_v1 }
 0x85e   :  { %v1114_v63 = vpop.f32.mrb[32].mxu0 }
 0x85f   :  { %v2405_v0 = vpop.f32.mrb[33].mxu0 }
 0x860   :  { %v1117_v2 = vpop.f32.mrb[34].mxu0 }
 0x861   :  { %v2406_v4 = vpop.f32.mrb[35].mxu0  ;;  %2410 = vmatmul.mubr.msk.bf16.vlgmr.msra.gmra.mrb[16].mxu1 %vm560_vm4, %v1122_v49 }
 0x862   :  { %2421 = vmatprep.mubr.msk.bf16.mxu1 %vm2983_vm0, %v2982_v1 }
 0x86b   :  { %v1215_v5 = vpop.f32.mrb[36].mxu0 }
 0x86c   :  { %v1216_v8 = vadd.f32 %v3316_v19, %v1215_v5  ;;  %v2417_v11 = vpop.f32.mrb[37].mxu0 }
 0x86d   :  { %v1218_v13 = vpop.f32.mrb[38].mxu0 }
 0x86e   :  { %v2418_v14 = vpop.f32.mrb[39].mxu0  ;;  %v1224_v15 = vsel %vm653_vm6, %v1216_v8, -inf }
 0x86f   :  { %1225 = vmax.xlane.f32.xlu1 %v1224_v15 }
 0x880   :  { %1293 = vrot.lane.b32.xlu1 %v3334_v44, %s2974_s3 }
 0x884   :  { %1406 = vrot.lane.b32.xlu1 %v3279_v3, %s2985_s4 }
 0x888   :  { %1404 = vrot.lane.b32.xlu1 %v3286_v7, %s2985_s4 }
 0x8fc   :  { %v1226_v16 = vpop.xlane.xlu1 %1225 }
 0x8fd   :  { %v1228_v20 = vsub.f32 %v1216_v8, %v1226_v16 }
 0x8ff   :  { %v1231_v21 = vmul.f32 1.442695, %v1228_v20 }
 0x900   :  { %v1294_v17 = vpop.permute.xlu1 %1293 }
 0x901   :  { %v1299_v18 = vsel %vm683_vm5, %v1294_v17, 0  ;;  %2637 = vpow2.f32 %v1231_v21 }
 0x902   :  { %2426 = vmatpush3.bf16.msra.mxu0 %v1299_v18 }
 0x903   :  { %2439 = vmatprep.subr.bf16.mxu0 %v2982_v1 }
 0x904   :  { %v1407_v45 = vpop.permute.xlu1 %1406 }
 0x905   :  { %v1412_v47 = vsel %vm560_vm4, %v1407_v45, 0 }
 0x908   :  { %v1405_v48 = vpop.permute.xlu1 %1404 }
 0x90b   :  { %v2638_v32 = vpop.eup %2637 }
 0x90c   :  { %v1236_v33 = vsel %vm653_vm6, %v2638_v32, 0.0 }
 0x92c   :  { %v1058_v22 = vpop.f32.mrb[12].mxu1 }
 0x92d   :  { %v3414_v23 = vadd.f32 %v1114_v63, %v1058_v22  ;;  %v2397_v24 = vpop.f32.mrb[13].mxu1 }
 0x92e   :  { %v1061_v25 = vpop.f32.mrb[14].mxu1 }
 0x92f   :  { %v3416_v26 = vadd.f32 %v1117_v2, %v1061_v25  ;;  %v2398_v3 = vpop.f32.mrb[15].mxu1 }
 0x934   :  { %v1165_v27 = vpop.f32.mrb[16].mxu1 }
 0x935   :  { %v1166_v7 = vadd.f32 %v3309_v12, %v1165_v27  ;;  %v2411_v28 = vpop.f32.mrb[17].mxu1 }
 0x936   :  { %v1168_v29 = vpop.f32.mrb[18].mxu1 }
 0x937   :  { %v2412_v30 = vpop.f32.mrb[19].mxu1  ;;  %v1221_v31 = vsel %vm653_vm6, %v1166_v7, -inf }
 0x938   :  { %1222 = vmax.xlane.f32.xlu0 %v1221_v31 }
 0x93c   :  { %1237 = vadd.xlane.f32.xlu0 %v1236_v33 }
 0x9c5   :  { %v1223_v34 = vpop.xlane.xlu0 %1222 }
 0x9c6   :  { %v1227_v35 = vsub.f32 %v1166_v7, %v1223_v34 }
 0x9c8   :  { %v1229_v36 = vmul.f32 1.442695, %v1227_v35 }
 0x9c9   :  { %v1238_v37 = vpop.xlane.xlu0 %1237 }
 0x9ca   :  { %2639 = vpow2.f32 %v1229_v36 }
 0x9cb   :  { %2641 = vrcp.f32 %v1238_v37 }
 0x9d4   :  { %v2640_v38 = vpop.eup %2639 }
 0x9d5   :  { %v2642_v39 = vpop.eup %2641  ;;  %v1233_v40 = vsel %vm653_vm6, %v2640_v38, 0.0 }
 0x9d6   :  { %v1242_v43 = vmul.f32 %v2642_v39, %v2638_v32  ;;  %1234 = vadd.xlane.f32.xlu0 %v1233_v40 }
 0x9d8   :  { %v1244_v46 = vpack.c.bf16 %v1242_v43, %v1242_v43 }
 0x9da   :  { %2428 = vmatmul.mubr.msk.bf16.vlgmr.msra.gmra.mrb[40].mxu0 %vm653_vm6, %v1244_v46 }
 0x9db   :  { %2440 = vmatpush3.bf16.xpose.msra.mxu0 %v1412_v47  ;;  %2441 = vmatprep.mubr.msk.bf16.mxu0 %vm2983_vm0, %v2982_v1 }
 0x9dc   :  { %2451 = vmatprep.subr.bf16.mxu0 %v2982_v1 }
 0x9e2   :  { %2442 = vmatmul.mubr.msk.bf16.vlgmr.msra.gmra.mrb[44].mxu0 %vm560_vm4, %v1405_v48 }
 0x9e3   :  { %2453 = vmatprep.mubr.msk.bf16.mxu0 %vm2983_vm0, %v2982_v1 }
 0x9ec   :  { %1245 = vrot.lane.b32.xlu0 %v3295_v9, %s2974_s3 }
 0x9f0   :  { %1456 = vrot.lane.b32.xlu0 %v3284_v6, %s2985_s4 }
 0x9f4   :  { %1454 = vrot.lane.b32.xlu0 %v3297_v10, %s2985_s4 }
 0xa63   :  { %v1235_v49 = vpop.xlane.xlu0 %1234 }
 0xa64   :  { %2643 = vrcp.f32 %v1235_v49 }
 0xa67   :  { %v1246_v50 = vpop.permute.xlu0 %1245 }
 0xa68   :  { %v1251_v51 = vsel %vm683_vm5, %v1246_v50, 0 }
 0xa69   :  { %2420 = vmatpush3.bf16.msra.mxu1 %v1251_v51 }
 0xa6a   :  { %2431 = vmatprep.subr.bf16.mxu1 %v2982_v1 }
 0xa6b   :  { %v1457_v2 = vpop.permute.xlu0 %1456 }
 0xa6c   :  { %v1462_v13 = vsel %vm560_vm4, %v1457_v2, 0 }
 0xa6e   :  { %v2644_v52 = vpop.eup %2643 }
 0xa6f   :  { %v1241_v53 = vmul.f32 %v2644_v52, %v2640_v38 }
 0xa71   :  { %v1243_v55 = vpack.c.bf16 %v1241_v53, %v1241_v53  ;;  %v2596_v53 = vld [vmem:[#allocation7 + $0x38] sm:$0xff]  }
 0xa73   :  { %2422 = vmatmul.mubr.msk.bf16.vlgmr.msra.gmra.mrb[20].mxu1 %vm653_vm6, %v1243_v55 }
 0xa74   :  { %2432 = vmatpush3.bf16.msra.mxu1 %v2593_v54  ;;  %2435 = vmatprep.mubr.msk.bf16.mxu1 %vm2983_vm0, %v2982_v1 }
 0xa75   :  { %2433 = vmatprep.subr.bf16.mxu1 %v2982_v1 }
 0xa78   :  { %2434 = vmatpush3.bf16.msra.mxu1 %v2594_v56 }
 0xa79   :  { %2445 = vmatprep.subr.bf16.mxu1 %v2982_v1 }
 0xaad   :  { %v1335_v6 = vpop.f32.mrb[40].mxu0 }
 0xaae   :  { %v2429_v10 = vpop.f32.mrb[41].mxu0 }
 0xaaf   :  { %v1338_v57 = vpop.f32.mrb[42].mxu0 }
 0xab0   :  { %v2430_v58 = vpop.f32.mrb[43].mxu0 }
 0xab1   :  { %v2203_v58 = vld [vmem:[#allocation8] ss:$0 sm:$0xff] }
 0xab5   :  { %v1448_v59 = vpop.f32.mrb[44].mxu0 }
 0xab6   :  { %v1449_v60 = vadd.f32 %v3309_v12, %v1448_v59  ;;  %v2443_v61 = vpop.f32.mrb[45].mxu0  ;;  %v1455_v12 = vpop.permute.xlu0 %1454 }
 0xab7   :  { %v1451_v62 = vpop.f32.mrb[46].mxu0 }
 0xab8   :  { %v2444_v63 = vpop.f32.mrb[47].mxu0  ;;  %v1504_v0 = vsel %vm653_vm6, %v1449_v60, -inf }
 0xab9   :  { %1505 = vmax.xlane.f32.xlu1 %v1504_v0 }
 0xb46   :  { %v1287_v4 = vpop.f32.mrb[20].mxu1  ;;  %v1506_v15 = vpop.xlane.xlu1 %1505 }
 0xb47   :  { %v1341_v5 = vpack.c.bf16 %v1335_v6, %v1287_v4  ;;  %v2423_v8 = vpop.f32.mrb[21].mxu1  ;;  %v1510_v16 = vsub.f32 %v1449_v60, %v1506_v15 }
 0xb48   :  { %v1290_v11 = vpop.f32.mrb[22].mxu1  ;;  %v2597_v8 = vld [vmem:[#allocation13] sm:$0xff]  }
 0xb49   :  { %v2424_v14 = vpop.f32.mrb[23].mxu1  ;;  %2436 = vmatmul.mubr.msk.bf16.vlgmr.msra.gmra.mrb[24].mxu1 %vm560_vm4, %v1341_v5  ;;  %v1512_v17 = vmul.f32 1.442695, %v1510_v16  ;;  %v2598_v11 = vld [vmem:[#allocation13 + $0x8] sm:$0xff]  }
 0xb4a   :  { %2446 = vmatpush3.bf16.xpose.msra.mxu1 %v1462_v13  ;;  %2447 = vmatprep.mubr.msk.bf16.mxu1 %vm2983_vm0, %v2982_v1 }
 0xb4b   :  { %2457 = vmatprep.subr.bf16.mxu1 %v2982_v1  ;;  %2645 = vpow2.f32 %v1512_v17 }
 0xb51   :  { %2448 = vmatmul.mubr.msk.bf16.vlgmr.msra.gmra.mrb[28].mxu1 %vm560_vm4, %v1455_v12 }
 0xb52   :  { %2459 = vmatprep.mubr.msk.bf16.mxu1 %vm2983_vm0, %v2982_v1 }
 0xb55   :  { %v2646_v31 = vpop.eup %2645 }
 0xc1c   :  { %v1395_v18 = vpop.f32.mrb[24].mxu1 }
 0xc1d   :  { %v3454_v20 = vadd.f32 %v1395_v18, %v3414_v23  ;;  %v2437_v21 = vpop.f32.mrb[25].mxu1  ;;  %v1516_v23 = vsel %vm653_vm6, %v2646_v31, 0.0 }
 0xc1e   :  { %v1398_v22 = vpop.f32.mrb[26].mxu1  ;;  %v2601_v21 = vld [vmem:[#allocation13 + $0x20] sm:$0xff]  }
 0xc1f   :  { %v3457_v24 = vadd.f32 %v1398_v22, %v3416_v26  ;;  %v2438_v25 = vpop.f32.mrb[27].mxu1  ;;  %v2602_v22 = vld [vmem:[#allocation13 + $0x28] sm:$0xff]  }
 0xc20   :  { %v2604_v25 = vld [vmem:[#allocation13 + $0x38] sm:$0xff]  }
 0xc24   :  { %v1498_v3 = vpop.f32.mrb[28].mxu1 }
 0xc25   :  { %v1499_v27 = vadd.f32 %v3316_v19, %v1498_v3  ;;  %v2449_v7 = vpop.f32.mrb[29].mxu1  ;;  %v2605_v3 = vld [vmem:[#allocation16] sm:$0xff]  }
 0xc26   :  { %v1501_v28 = vpop.f32.mrb[30].mxu1  ;;  %v2607_v7 = vld [vmem:[#allocation16 + $0x10] sm:$0xff]  }
 0xc27   :  { %v2450_v29 = vpop.f32.mrb[31].mxu1  ;;  %v1507_v30 = vsel %vm653_vm6, %v1499_v27, -inf  ;;  %v2608_v28 = vld [vmem:[#allocation16 + $0x18] sm:$0xff]  }
 0xc28   :  { %1508 = vmax.xlane.f32.xlu0 %v1507_v30  ;;  %v2609_v29 = vld [vmem:[#allocation16 + $0x20] sm:$0xff]   ;;  %v2610_v30 = vld [vmem:[#allocation16 + $0x28] sm:$0xff]  }
 0xc2c   :  { %1517 = vadd.xlane.f32.xlu0 %v1516_v23 }
 0xc42   :  { %1528 = vrot.lane.b32.xlu0 %v3295_v9, %s2985_s4  ;;  %v2595_v9 = vld [vmem:[#allocation7 + $0x30] sm:$0xff]  }
 0xcb5   :  { %v1509_v32 = vpop.xlane.xlu0 %1508 }
 0xcb6   :  { %v1511_v26 = vsub.f32 %v1499_v27, %v1509_v32  ;;  %v2606_v27 = vld [vmem:[#allocation16 + $0x8] sm:$0xff]  }
 0xcb8   :  { %v1514_v33 = vmul.f32 1.442695, %v1511_v26 }
 0xcb9   :  { %v1518_v34 = vpop.xlane.xlu0 %1517 }
 0xcba   :  { %2647 = vpow2.f32 %v1514_v33 }
 0xcbb   :  { %2649 = vrcp.f32 %v1518_v34 }
 0xcbd   :  { %v1529_v19 = vpop.permute.xlu0 %1528 }
 0xcbe   :  { %v1534_v35 = vsel %vm683_vm5, %v1529_v19, 0 }
 0xcbf   :  { %2452 = vmatpush3.bf16.msra.mxu0 %v1534_v35  ;;  %v2204_v35 = vld [vmem:[#allocation10] ss:$0 sm:$0xff] }
 0xcc0   :  { %2463 = vmatprep.subr.bf16.mxu0 %v2982_v1 }
 0xcc4   :  { %v2648_v36 = vpop.eup %2647 }
 0xcc5   :  { %v2650_v37 = vpop.eup %2649  ;;  %v1519_v38 = vsel %vm653_vm6, %v2648_v36, 0.0 }
 0xcc6   :  { %v1524_v39 = vmul.f32 %v2650_v37, %v2646_v31  ;;  %1520 = vadd.xlane.f32.xlu1 %v1519_v38 }
 0xcc8   :  { %v1526_v40 = vpack.c.bf16 %v1524_v39, %v1524_v39 }
 0xcca   :  { %2454 = vmatmul.mubr.msk.bf16.vlgmr.msra.gmra.mrb[48].mxu0 %vm653_vm6, %v1526_v40  ;;  %v2205_v40 = vld [vmem:[#allocation11] ss:$0 sm:$0xff] }
 0xccb   :  { %2467 = vmatprep.mubr.msk.bf16.mxu0 %vm2983_vm0, %v2982_v1  ;;  %2464 = vmatpush3.bf16.msra.mxu0 %v2595_v9 }
 0xccc   :  { %2465 = vmatprep.subr.bf16.mxu0 %v2982_v1 }
 0xccf   :  { %2466 = vmatpush3.bf16.msra.mxu0 %v2596_v53 }
 0xcd0   :  { %2491 = vmatprep.subr.bf16.mxu0 %v2982_v1 }
 0xcd7   :  { %1576 = vrot.lane.b32.xlu1 %v3334_v44, %s2985_s4 }
 0xd53   :  { %v1521_v43 = vpop.xlane.xlu1 %1520 }
 0xd54   :  { %2651 = vrcp.f32 %v1521_v43 }
 0xd57   :  { %v1577_v45 = vpop.permute.xlu1 %1576 }
 0xd58   :  { %v1582_v46 = vsel %vm683_vm5, %v1577_v45, 0 }
 0xd59   :  { %2458 = vmatpush3.bf16.msra.mxu1 %v1582_v46 }
 0xd5a   :  { %2471 = vmatprep.subr.bf16.mxu1 %v2982_v1 }
 0xd5e   :  { %v2652_v47 = vpop.eup %2651 }
 0xd5f   :  { %v1525_v48 = vmul.f32 %v2652_v47, %v2648_v36  ;;  %v2611_v47 = vld [vmem:[#allocation16 + $0x30] sm:$0xff]  }
 0xd61   :  { %v1527_v49 = vpack.c.bf16 %v1525_v48, %v1525_v48  ;;  %v2612_v48 = vld [vmem:[#allocation16 + $0x38] sm:$0xff]  }
 0xd63   :  { %2460 = vmatmul.mubr.msk.bf16.vlgmr.msra.gmra.mrb[32].mxu1 %vm653_vm6, %v1527_v49  ;;  %v2206_v49 = vld [vmem:[#allocation14] ss:$0 sm:$0xff] }
 0xd64   :  { %2487 = vmatprep.mubr.msk.bf16.mxu1 %vm2983_vm0, %v2982_v1  ;;  %2472 = vmatpush3.bf16.msra.mxu1 %v2597_v8 }
 0xd65   :  { %2473 = vmatprep.subr.bf16.mxu1 %v2982_v1 }
 0xd68   :  { %2474 = vmatpush3.bf16.msra.mxu1 %v2598_v11 }
 0xd69   :  { %2475 = vmatprep.subr.bf16.mxu1 %v2982_v1 }
 0xd9d   :  { %v1570_v44 = vpop.f32.mrb[48].mxu0 }
 0xd9e   :  { %v2455_v50 = vpop.f32.mrb[49].mxu0 }
 0xd9f   :  { %v1573_v51 = vpop.f32.mrb[50].mxu0 }
 0xda0   :  { %v2456_v52 = vpop.f32.mrb[51].mxu0 }
 0xe36   :  { %v1618_v54 = vpop.f32.mrb[32].mxu1 }
 0xe37   :  { %v1624_v55 = vpack.c.bf16 %v1618_v54, %v1570_v44  ;;  %v2461_v56 = vpop.f32.mrb[33].mxu1 }
 0xe38   :  { %v1621_v6 = vpop.f32.mrb[34].mxu1 }
 0xe39   :  { %v2462_v10 = vpop.f32.mrb[35].mxu1  ;;  %2468 = vmatmul.mubr.msk.bf16.vlgmr.msra.gmra.mrb[52].mxu0 %vm560_vm4, %v1624_v55 }
 0xe3a   :  { %2507 = vmatprep.mubr.msk.bf16.mxu0 %vm2983_vm0, %v2982_v1  ;;  %2492 = vmatpush3.bf16.msra.mxu0 %v2605_v3  ;;  %v2215_v10 = vld [vmem:[#allocation17] ss:$0 sm:$0xff] }
 0xe3b   :  { %2493 = vmatprep.subr.bf16.mxu0 %v2982_v1 }
 0xe3e   :  { %2494 = vmatpush3.bf16.msra.mxu0 %v2606_v27 }
 0xe3f   :  { %2495 = vmatprep.subr.bf16.mxu0 %v2982_v1 }
 0xe42   :  { %2496 = vmatpush3.bf16.msra.mxu0 %v2607_v7 }
 0xe43   :  { %2497 = vmatprep.subr.bf16.mxu0 %v2982_v1 }
 0xe46   :  { %2498 = vmatpush3.bf16.msra.mxu0 %v2608_v28 }
 0xe47   :  { %2499 = vmatprep.subr.bf16.mxu0 %v2982_v1 }
 0xe4a   :  { %2500 = vmatpush3.bf16.msra.mxu0 %v2609_v29  ;;  %v2224_v29 = vld [vmem:[#allocation19] ss:$0 sm:$0xff] }
 0xe4b   :  { %2501 = vmatprep.subr.bf16.mxu0 %v2982_v1 }
 0xe4e   :  { %2502 = vmatpush3.bf16.msra.mxu0 %v2610_v30 }
 0xe4f   :  { %2503 = vmatprep.subr.bf16.mxu0 %v2982_v1 }
 0xe52   :  { %2504 = vmatpush3.bf16.msra.mxu0 %v2611_v47 }
 0xe53   :  { %2505 = vmatprep.subr.bf16.mxu0 %v2982_v1 }
 0xe56   :  { %2506 = vmatpush3.bf16.msra.mxu0 %v2612_v48 }
 0xf0c   :  { %v1678_v57 = vpop.f32.mrb[52].mxu0 }
 0xf0d   :  { %v1685_v59 = vadd.f32 %v1678_v57, %v3454_v20  ;;  %v2469_v60 = vpop.f32.mrb[53].mxu0  ;;  %v2600_v20 = vld [vmem:[#allocation13 + $0x18] sm:$0xff]  }
 0xf0e   :  { %v1681_v61 = vpop.f32.mrb[54].mxu0 }
 0xf0f   :  { %v1694_v62 = vadd.f32 %v2203_v58, %v1685_v59  ;;  %v1686_v63 = vadd.f32 %v1681_v61, %v3457_v24  ;;  %v2470_v0 = vpop.f32.mrb[55].mxu0  ;;  %v2603_v24 = vld [vmem:[#allocation13 + $0x30] sm:$0xff]  }
 0xf11   :  { %v1695_v2 = vadd.f32 %v2203_v58, %v1686_v63  ;;  %v1696_v4 = vadd.f32 %v1694_v62, %v3264_v41 }
 0xf13   :  { %1698 = vadd.xlane.f32.xlu1 %v1696_v4  ;;  %v1697_v5 = vadd.f32 %v1695_v2, %v3266_v42  ;;  %v2599_v42 = vld [vmem:[#allocation13 + $0x10] sm:$0xff]   ;;  %v2613_v2 = vld [vmem:[%s3568_s16] sm:$0xff]  }
 0xf14   :  { %2476 = vmatpush3.bf16.msra.mxu1 %v2599_v42  ;;  %v2618_v42 = vld [vmem:[%s3568_s16 + $0x28] sm:$0xff]  }
 0xf15   :  { %1700 = vadd.xlane.f32.xlu0 %v1697_v5  ;;  %2477 = vmatprep.subr.bf16.mxu1 %v2982_v1 }
 0xf18   :  { %2478 = vmatpush3.bf16.msra.mxu1 %v2600_v20  ;;  %v2619_v20 = vld [vmem:[%s3568_s16 + $0x30] sm:$0xff]  }
 0xf19   :  { %2479 = vmatprep.subr.bf16.mxu1 %v2982_v1 }
 0xf1c   :  { %2480 = vmatpush3.bf16.msra.mxu1 %v2601_v21  ;;  %v2620_v21 = vld [vmem:[%s3568_s16 + $0x38] sm:$0xff]  }
 0xf1d   :  { %2481 = vmatprep.subr.bf16.mxu1 %v2982_v1 }
 0xf20   :  { %2482 = vmatpush3.bf16.msra.mxu1 %v2602_v22 }
 0xf21   :  { %2483 = vmatprep.subr.bf16.mxu1 %v2982_v1 }
 0xf24   :  { %2484 = vmatpush3.bf16.msra.mxu1 %v2603_v24 }
 0xf25   :  { %2485 = vmatprep.subr.bf16.mxu1 %v2982_v1 }
 0xf28   :  { %2486 = vmatpush3.bf16.msra.mxu1 %v2604_v25 }
 0xf29   :  { %2511 = vmatprep.subr.bf16.mxu1 %v2982_v1 }
 0xfa0   :  { %v1699_v13 = vpop.xlane.xlu1 %1698 }
 0xfa1   :  { %v1703_v14 = vmul.f32 0.0078125, %v1699_v13 }
 0xfa2   :  { %v1701_v12 = vpop.xlane.xlu0 %1700 }
 0xfa3   :  { %v1705_v15 = vsub.f32 %v1696_v4, %v1703_v14  ;;  %v1704_v16 = vmul.f32 0.0078125, %v1701_v12  ;;  %v2614_v4 = vld [vmem:[%s3568_s16 + $0x8] sm:$0xff]  }
 0xfa5   :  { %v1706_v17 = vsub.f32 %v1697_v5, %v1704_v16  ;;  %v1707_v18 = vmul.f32 %v1705_v15, %v1705_v15 }
 0xfa7   :  { %1709 = vadd.xlane.f32.xlu0 %v1707_v18  ;;  %v1708_v41 = vmul.f32 %v1706_v17, %v1706_v17  ;;  %v2616_v18 = vld [vmem:[%s3568_s16 + $0x18] sm:$0xff]  }
 0xfa9   :  { %1711 = vadd.xlane.f32.xlu1 %v1708_v41  ;;  %v2617_v41 = vld [vmem:[%s3568_s16 + $0x20] sm:$0xff]  }
0x1034   :  { %v1710_v31 = vpop.xlane.xlu0 %1709 }
0x1035   :  { %v1713_v23 = vmul.f32 0.0078125, %v1710_v31 }
0x1036   :  { %v1712_v32 = vpop.xlane.xlu1 %1711 }
0x1037   :  { %v1715_v26 = vadd.f32 1e-05, %v1713_v23  ;;  %v1714_v33 = vmul.f32 0.0078125, %v1712_v32 }
0x1039   :  { %2653 = vrsqrt.f32 %v1715_v26  ;;  %v1716_v34 = vadd.f32 1e-05, %v1714_v33  ;;  %v2225_v26 = vld [vmem:[#allocation20] ss:$0 sm:$0xff] }
0x103b   :  { %2655 = vrsqrt.f32 %v1716_v34 }
0x1043   :  { %v2654_v19 = vpop.eup %2653 }
0x1044   :  { %v1719_v36 = vmul.f32 %v2654_v19, %v1705_v15 }
0x1045   :  { %v2656_v37 = vpop.eup %2655 }
0x1046   :  { %v1720_v38 = vmul.f32 %v2656_v37, %v1706_v17  ;;  %v1728_v39 = vmul.f32 %v2204_v35, %v1719_v36  ;;  %v2615_v17 = vld [vmem:[%s3568_s16 + $0x10] sm:$0xff]  }
0x1048   :  { %v1729_v9 = vmul.f32 %v2204_v35, %v1720_v38  ;;  %v1737_v43 = vadd.f32 %v2205_v40, %v1728_v39  ;;  %v2226_v35 = vld [vmem:[%s3569_s17] ss:$0 sm:$0xff] }
0x104a   :  { %v1738_v45 = vadd.f32 %v2205_v40, %v1729_v9 }
0x104c   :  { %v1739_v46 = vpack.c.bf16 %v1738_v45, %v1737_v43 }
0x104e   :  { %2488 = vmatmul.mubr.bf16.vlgmr.msra.gmra.mrb[36].mxu1 %v1739_v46 }
0x104f   :  { %2527 = vmatprep.mubr.msk.bf16.mxu1 %vm2983_vm0, %v2982_v1  ;;  %2512 = vmatpush3.bf16.msra.mxu1 %v2613_v2 }
0x1050   :  { %2513 = vmatprep.subr.bf16.mxu1 %v2982_v1 }
0x1053   :  { %2514 = vmatpush3.bf16.msra.mxu1 %v2614_v4 }
0x1054   :  { %2515 = vmatprep.subr.bf16.mxu1 %v2982_v1 }
0x1057   :  { %2516 = vmatpush3.bf16.msra.mxu1 %v2615_v17 }
0x1058   :  { %2517 = vmatprep.subr.bf16.mxu1 %v2982_v1 }
0x105b   :  { %2518 = vmatpush3.bf16.msra.mxu1 %v2616_v18 }
0x105c   :  { %2519 = vmatprep.subr.bf16.mxu1 %v2982_v1 }
0x105f   :  { %2520 = vmatpush3.bf16.msra.mxu1 %v2617_v41 }
0x1060   :  { %2521 = vmatprep.subr.bf16.mxu1 %v2982_v1 }
0x1063   :  { %2522 = vmatpush3.bf16.msra.mxu1 %v2618_v42 }
0x1064   :  { %2523 = vmatprep.subr.bf16.mxu1 %v2982_v1 }
0x1067   :  { %2524 = vmatpush3.bf16.msra.mxu1 %v2619_v20 }
0x1068   :  { %2525 = vmatprep.subr.bf16.mxu1 %v2982_v1 }
0x106b   :  { %2526 = vmatpush3.bf16.msra.mxu1 %v2620_v21 }
0x1121   :  { %v1845_v44 = vpop.f32.mrb[36].mxu1 }
0x1122   :  { %v1846_v50 = vadd.f32 %v2206_v49, %v1845_v44  ;;  %v2489_v51 = vpop.f32.mrb[37].mxu1 }
0x1123   :  { %v1848_v52 = vpop.f32.mrb[38].mxu1 }
0x1124   :  { %v1849_v53 = vadd.f32 %v2206_v49, %v1848_v52  ;;  %v2490_v54 = vpop.f32.mrb[39].mxu1  ;;  %v1852_v55 = vmax.f32 %v1846_v50, 0.0 }
0x1126   :  { %v1853_v56 = vmax.f32 %v1849_v53, 0.0 }
0x1128   :  { %v1854_v6 = vpack.c.bf16 %v1853_v56, %v1852_v55 }
0x112a   :  { %2508 = vmatmul.mubr.bf16.vlgmr.msra.gmra.mrb[56].mxu0 %v1854_v6 }
0x11fd   :  { %v1960_v57 = vpop.f32.mrb[56].mxu0 }
0x11fe   :  { %v1961_v58 = vadd.f32 %v2215_v10, %v1960_v57  ;;  %v2509_v59 = vpop.f32.mrb[57].mxu0 }
0x11ff   :  { %v1963_v60 = vpop.f32.mrb[58].mxu0 }
0x1200   :  { %v1964_v61 = vadd.f32 %v2215_v10, %v1963_v60  ;;  %v2510_v62 = vpop.f32.mrb[59].mxu0  ;;  %v1967_v63 = vadd.f32 %v1961_v58, %v1737_v43 }
0x1202   :  { %1969 = vadd.xlane.f32.xlu0 %v1967_v63  ;;  %v1968_v0 = vadd.f32 %v1964_v61, %v1738_v45 }
0x1204   :  { %1971 = vadd.xlane.f32.xlu1 %v1968_v0 }
0x128f   :  { %v1970_v5 = vpop.xlane.xlu0 %1969 }
0x1290   :  { %v1973_v8 = vmul.f32 0.0078125, %v1970_v5 }
0x1291   :  { %v1972_v11 = vpop.xlane.xlu1 %1971 }
0x1292   :  { %v1975_v13 = vsub.f32 %v1967_v63, %v1973_v8  ;;  %v1974_v14 = vmul.f32 0.0078125, %v1972_v11 }
0x1294   :  { %v1976_v12 = vsub.f32 %v1968_v0, %v1974_v14  ;;  %v1977_v15 = vmul.f32 %v1975_v13, %v1975_v13 }
0x1296   :  { %1979 = vadd.xlane.f32.xlu0 %v1977_v15  ;;  %v1978_v16 = vmul.f32 %v1976_v12, %v1976_v12 }
0x1298   :  { %1981 = vadd.xlane.f32.xlu1 %v1978_v16 }
0x1323   :  { %v1980_v22 = vpop.xlane.xlu0 %1979 }
0x1324   :  { %v1983_v24 = vmul.f32 0.0078125, %v1980_v22 }
0x1325   :  { %v1982_v25 = vpop.xlane.xlu1 %1981 }
0x1326   :  { %v1985_v3 = vadd.f32 1e-05, %v1983_v24  ;;  %v1984_v27 = vmul.f32 0.0078125, %v1982_v25 }
0x1328   :  { %2657 = vrsqrt.f32 %v1985_v3  ;;  %v1986_v7 = vadd.f32 1e-05, %v1984_v27 }
0x132a   :  { %2659 = vrsqrt.f32 %v1986_v7 }
0x1332   :  { %v2658_v28 = vpop.eup %2657 }
0x1333   :  { %v1989_v30 = vmul.f32 %v2658_v28, %v1975_v13 }
0x1334   :  { %v2660_v31 = vpop.eup %2659 }
0x1335   :  { %v1990_v23 = vmul.f32 %v2660_v31, %v1976_v12  ;;  %v1998_v32 = vmul.f32 %v2224_v29, %v1989_v30 }
0x1337   :  { %v1999_v33 = vmul.f32 %v2224_v29, %v1990_v23  ;;  %v2007_v34 = vadd.f32 %v2225_v26, %v1998_v32 }
0x1339   :  { %v2008_v19 = vadd.f32 %v2225_v26, %v1999_v33 }
0x133b   :  { %v2009_v1 = vpack.c.bf16 %v2008_v19, %v2007_v34 }
0x133d   :  { %2528 = vmatmul.mubr.bf16.vlgmr.msra.gmra.mrb[40].mxu1 %v2009_v1 }
0x1410   :  { %v2115_v36 = vpop.f32.mrb[40].mxu1 }
0x1411   :  { %v2116_v37 = vadd.f32 %v2226_v35, %v2115_v36  ;;  %v2529_v38 = vpop.f32.mrb[41].mxu1 }
0x1412   :  { %v2118_v39 = vpop.f32.mrb[42].mxu1 }
0x1413   :  { %2122 = vst [vmem:[#allocation22] sm:$0xff] %v2116_v37  ;;  %v2119_v40 = vadd.f32 %v2226_v35, %v2118_v39  ;;  %v2530_v9 = vpop.f32.mrb[43].mxu1 }
0x1415   :  { %2123 = vst [vmem:[#allocation22 + $0x8] sm:$0xff] %v2119_v40 }
0x1416   :  { %2936 = shalt.err (!%p2933_p2)
}
0x1417   :  { %s3581_s12 = sld [smem:[#allocation34_spill]] }
0x141d   :  { %s2937_s18 = scalar_lea.hbm %s3581_s12, 256 }
0x141e   :  { %p2938_p3 = scmp.ne.s32.totalorder %s3581_s12, %s2937_s18  ;;  %p2941_p4 = scmp.lt.u32.totalorder %s2937_s18, %s3581_s12 }
0x1420   :  { %p2943_p5 = pnand %p2941_p4, %p2938_p3 }
0x1422   :  { %2946 = shalt.err (!%p2943_p5)
}
0x1423   :  { %2135 = dma.vmem_to_hbm [thread:$0]  %s2130_s21, 256, %s3581_s12, [#allocation4], %s2971_s13, %s2971_s13, %s2972_s28  }
0x1424   :  { %2961 = dma.done.wait [#allocation4], 256  }
0x1425   :  { %2962 = vsyncadd [#allocation4], 4294967040 }
0x1426   :  { %2139 = vsyncpa [#allocation3], 1 }
0x1427   :  { %2140 = vsyncpa [#allocation6], 1 }
0x1428   :  { %2141 = vsyncpa [#allocation9], 1 }
0x1429   :  { %2142 = vsyncpa [#allocation12], 1 }
0x142a   :  { %2143 = vsyncpa [#allocation15], 1 }
0x142b   :  { %2144 = vsyncpa [#allocation18], 1 }
0x142c   :  { %2145 = vsyncpa [#allocation21], 1 }
0x142d   :  { %2146 = vsyncpa [#allocation4], 1 }

</bundles_post_ra>
